<compile_context>
chip_gen: v7x
topology: tpu7x:2x2x1
jax: 0.10.0
libtpu: 0.0.40
codegen_flags: <defaults>
</compile_context>

<pallas_src>
import functools

import jax
import jax.numpy as jnp
import numpy as np
from jax.experimental import pallas as pl
from jax.experimental.pallas import tpu as pltpu

_VMEM_LIMIT = 32 * 1024 * 1024   # fits v5e default scope .. v7x 64 MiB physical
_BATCH_BLOCK = 8                 # images per conv grid step (VMEM-safe on v7x)
_MLP_BLOCK_ROWS = 128            # batch tile for the fused fc1/fc2 head


def _largest_divisor_leq(n, cap):
    for b in range(min(n, cap), 0, -1):
        if n % b == 0:
            return b
    return 1


# ----------------------------------------------------------------------------
# Conv2d (valid padding, cross-correlation) + bias + ReLU, batch-blocked.
# ----------------------------------------------------------------------------
def _conv_relu_kernel(x_ref, w_ref, b_ref, o_ref, *, K, stride, oh, ow):
    """x_ref: (B_blk, Hs, Ws, s*s*Cin) phase-packed images (VMEM)
    w_ref: (K*K*Cin, Cout) weights, rows in (dy, dx, a, b, cin) order
    b_ref: (1, Cout) f32 bias;  o_ref: (B_blk, oh, ow, Cout) NHWC output."""
    s = stride
    kd = K // s                      # K % s == 0 for the 8/4, 4/2, 3/1 stack
    B = x_ref.shape[0]

    # Slab gather: (K/s)^2 full-minor-width slices of the VMEM tile.  For
    # fixed (dy, dx) the packed minor dim already holds every (a, b, cin)
    # phase, so no narrow lane slices and no K*K-way concatenate.
    slabs = []
    for dy in range(kd):
        for dx in range(kd):
            slabs.append(x_ref[:, dy:dy + oh, dx:dx + ow, :])   # (B, oh, ow, s*s*Cin)
    p = jnp.concatenate(slabs, axis=-1)                         # (B, oh, ow, K*K*Cin)
    kkc = p.shape[-1]

    # One MXU matmul for the whole batch block (M = B*oh*ow); f32 accumulate.
    p = p.reshape(B * oh * ow, kkc).astype(w_ref.dtype)
    y = jnp.dot(p, w_ref[...], preferred_element_type=jnp.float32)
    y = jnp.maximum(y + b_ref[...], 0.0)                        # bias + ReLU in f32
    o_ref[...] = y.reshape(B, oh, ow, -1).astype(o_ref.dtype)


def _phase_pack(x, s, channels_last):
    """Space-to-depth repack: result[n, hs, ws, (a*s+b)*C + c] == x[n, hs*s+a, ws*s+b, c]
    (NHWC indexing).  Same byte count as the input; keeps the minor dim (s*s*C)
    large so the HBM layout stays tile-dense.  Padded rows are never read."""
    if channels_last:
        N, H, W, C = x.shape
    else:
        N, C, H, W = x.shape
    Hs = (H + s - 1) // s
    Ws = (W + s - 1) // s
    if s == 1:
        xs = x if channels_last else jnp.transpose(x, (0, 2, 3, 1))
        return xs, Hs, Ws
    pad_h, pad_w = Hs * s - H, Ws * s - W
    if channels_last:
        if pad_h or pad_w:
            x = jnp.pad(x, ((0, 0), (0, pad_h), (0, pad_w), (0, 0)))
        x = x.reshape(N, Hs, s, Ws, s, C).transpose(0, 1, 3, 2, 4, 5)
    else:
        if pad_h or pad_w:
            x = jnp.pad(x, ((0, 0), (0, 0), (0, pad_h), (0, pad_w)))
        x = x.reshape(N, C, Hs, s, Ws, s).transpose(0, 2, 4, 3, 5, 1)
    return x.reshape(N, Hs, Ws, s * s * C), Hs, Ws


def conv2d_relu_pallas(x, w2d, b2, *, kernel_size, stride, channels_last,
                       batch_block=_BATCH_BLOCK):
    """x: (N,C,H,W) if not channels_last else (N,H,W,C); w2d: (K*K*C, Cout) with
    rows in (dy, dx, a, b, cin) order; b2: (1, Cout) f32.
    Returns NHWC (N, oh, ow, Cout) float32."""
    K, s = kernel_size, stride
    assert K % s == 0
    if channels_last:
        N, H, W, C = x.shape
    else:
        N, C, H, W = x.shape
    Cout = w2d.shape[1]
    assert w2d.shape[0] == K * K * C
    oh = (H - K) // s + 1
    ow = (W - K) // s + 1

    xs, Hs, Ws = _phase_pack(x, s, channels_last)      # (N, Hs, Ws, s*s*C)
    P = s * s * C
    B_blk = _largest_divisor_leq(N, batch_block)

    kernel = functools.partial(_conv_relu_kernel, K=K, stride=s, oh=oh, ow=ow)
    return pl.pallas_call(
        kernel,
        out_shape=jax.ShapeDtypeStruct((N, oh, ow, Cout), jnp.float32),
        grid=(N // B_blk,),
        in_specs=[
            pl.BlockSpec((B_blk, Hs, Ws, P), lambda n: (n, 0, 0, 0)),
            pl.BlockSpec((K * K * C, Cout), lambda n: (0, 0)),
            pl.BlockSpec((1, Cout), lambda n: (0, 0)),
        ],
        out_specs=pl.BlockSpec((B_blk, oh, ow, Cout), lambda n: (n, 0, 0, 0)),
        compiler_params=pltpu.CompilerParams(
            dimension_semantics=("parallel",),
            vmem_limit_bytes=_VMEM_LIMIT,
        ),
    )(xs, w2d, b2)


# ----------------------------------------------------------------------------
# Fused fc1 -> ReLU -> fc2 head (fc1 activation never leaves VMEM)
# ----------------------------------------------------------------------------
def _mlp_kernel(x_ref, w1_ref, b1_ref, w2_ref, b2_ref, o_ref):
    x = x_ref[...].astype(w1_ref.dtype)
    h = jnp.dot(x, w1_ref[...], preferred_element_type=jnp.float32)
    h = jnp.maximum(h + b1_ref[...], 0.0)                       # f32 bias + ReLU
    y = jnp.dot(h.astype(w2_ref.dtype), w2_ref[...],
                preferred_element_type=jnp.float32) + b2_ref[...]
    o_ref[...] = y.astype(o_ref.dtype)


def mlp_head_pallas(x, w1, b1, w2, b2, *, block_rows=_MLP_BLOCK_ROWS):
    N, F = x.shape
    H1 = w1.shape[1]
    A = w2.shape[1]                       # already lane-padded to a multiple of 128
    tm = min(N, block_rows)
    n_blocks = pl.cdiv(N, tm)
    Np = n_blocks * tm
    if Np != N:                           # pad remainder rows (garbage, sliced off)
        x = jnp.pad(x, ((0, Np - N), (0, 0)))
    out = pl.pallas_call(
        _mlp_kernel,
        out_shape=jax.ShapeDtypeStruct((Np, A), jnp.float32),
        grid=(n_blocks,),
        in_specs=[
            pl.BlockSpec((tm, F), lambda i: (i, 0)),
            pl.BlockSpec((F, H1), lambda i: (0, 0)),
            pl.BlockSpec((1, H1), lambda i: (0, 0)),
            pl.BlockSpec((H1, A), lambda i: (0, 0)),
            pl.BlockSpec((1, A), lambda i: (0, 0)),
        ],
        out_specs=pl.BlockSpec((tm, A), lambda i: (i, 0)),
        compiler_params=pltpu.CompilerParams(
            dimension_semantics=("parallel",),
            vmem_limit_bytes=_VMEM_LIMIT,
        ),
    )(x, w1, b1, w2, b2)
    return out[:N]


# ----------------------------------------------------------------------------
# Parameters: canonical PyTorch layout + one-time kernel-layout preparation.
# ----------------------------------------------------------------------------
def _uniform(key, shape, fan_in):
    bound = 1.0 / float(fan_in) ** 0.5
    return jax.random.uniform(key, shape, jnp.float32, -bound, bound)


def _conv_out(n, k, s):
    return (n - k) // s + 1


def init_dqn_params(key, n_actions, input_dims):
    """PyTorch-layout parameters (conv: OIHW; fc: (out, in), CHW flatten order)."""
    c_in, h, w = input_dims
    h1, w1 = _conv_out(h, 8, 4), _conv_out(w, 8, 4)
    h2, w2 = _conv_out(h1, 4, 2), _conv_out(w1, 4, 2)
    h3, w3 = _conv_out(h2, 3, 1), _conv_out(w2, 3, 1)
    fc_input_dims = 64 * h3 * w3

    ks = jax.random.split(key, 10)
    params = {
        "conv1_w": _uniform(ks[0], (32, c_in, 8, 8), c_in * 8 * 8),
        "conv1_b": _uniform(ks[1], (32,), c_in * 8 * 8),
        "conv2_w": _uniform(ks[2], (64, 32, 4, 4), 32 * 4 * 4),
        "conv2_b": _uniform(ks[3], (64,), 32 * 4 * 4),
        "conv3_w": _uniform(ks[4], (64, 64, 3, 3), 64 * 3 * 3),
        "conv3_b": _uniform(ks[5], (64,), 64 * 3 * 3),
        "fc1_w": _uniform(ks[6], (512, fc_input_dims), fc_input_dims),
        "fc1_b": _uniform(ks[7], (512,), fc_input_dims),
        "fc2_w": _uniform(ks[8], (n_actions, 512), 512),
        "fc2_b": _uniform(ks[9], (n_actions,), 512),
    }
    return params, (h3, w3), fc_input_dims


def prepare_params(params, conv3_hw, mxu_dtype=jnp.bfloat16):
    """One-time layout prep so the per-step forward does zero weight transposes:
      * conv weights -> (K*K*Cin, Cout) with rows in the kernel's slab order
        (dy, dx, phase_a, phase_b, cin), kh = dy*s + a, kw = dx*s + b
      * fc weights   -> (in, out); fc1 rows permuted from PyTorch (C,H,W) flatten
        order to the kernel's NHWC flatten order
      * fc2 output lane-padded to a multiple of 128 (unmasked stores)
      * matmul weights stored in `mxu_dtype` (bf16 = fast MXU path); biases f32."""
    h3, w3 = conv3_hw

    def conv_w(w, s):
        co, ci, kh, kw = w.shape
        w = jnp.transpose(w, (2, 3, 1, 0))           # (kh, kw, ci, co)
        w = w.reshape(kh // s, s, kw // s, s, ci, co)  # (dy, a, dx, b, ci, co)
        w = jnp.transpose(w, (0, 2, 1, 3, 4, 5))       # (dy, dx, a, b, ci, co)
        return w.reshape(kh * kw * ci, co).astype(mxu_dtype)

    f = 64 * h3 * w3
    # perm[i_nhwc] = i_chw for the (64, h3, w3) conv3 feature map
    perm = np.arange(f).reshape(64, h3, w3).transpose(1, 2, 0).reshape(-1)

    n_actions = params["fc2_w"].shape[0]
    a_pad = -(-n_actions // 128) * 128
    fc2_w = jnp.transpose(params["fc2_w"], (1, 0))             # (512, A)
    fc2_w = jnp.pad(fc2_w, ((0, 0), (0, a_pad - n_actions)))
    fc2_b = jnp.pad(params["fc2_b"], (0, a_pad - n_actions))

    return {
        "conv1_w": conv_w(params["conv1_w"], 4),
        "conv1_b": params["conv1_b"].reshape(1, -1).astype(jnp.float32),
        "conv2_w": conv_w(params["conv2_w"], 2),
        "conv2_b": params["conv2_b"].reshape(1, -1).astype(jnp.float32),
        "conv3_w": conv_w(params["conv3_w"], 1),
        "conv3_b": params["conv3_b"].reshape(1, -1).astype(jnp.float32),
        "fc1_w": jnp.transpose(params["fc1_w"], (1, 0))[perm].astype(mxu_dtype),
        "fc1_b": params["fc1_b"].reshape(1, -1).astype(jnp.float32),
        "fc2_w": fc2_w.astype(mxu_dtype),
        "fc2_b": fc2_b.reshape(1, -1).astype(jnp.float32),
    }


# ----------------------------------------------------------------------------
# Forward pass (matches DeepQNetwork.forward; state is NCHW float32)
# ----------------------------------------------------------------------------
@functools.partial(jax.jit, static_argnames=("n_actions",))
def dqn_forward(prep, state_nchw, n_actions):
    x = conv2d_relu_pallas(state_nchw, prep["conv1_w"], prep["conv1_b"],
                           kernel_size=8, stride=4, channels_last=False)
    x = conv2d_relu_pallas(x, prep["conv2_w"], prep["conv2_b"],
                           kernel_size=4, stride=2, channels_last=True)
    x = conv2d_relu_pallas(x, prep["conv3_w"], prep["conv3_b"],
                           kernel_size=3, stride=1, channels_last=True)
    x = x.reshape(x.shape[0], -1)   # NHWC flatten; fc1_w rows pre-permuted to match
    q = mlp_head_pallas(x, prep["fc1_w"], prep["fc1_b"],
                        prep["fc2_w"], prep["fc2_b"])
    return q[:, :n_actions]         # drop the 128-lane padding


# Pure-JAX reference (XLA convs, PyTorch layout) used only to validate Pallas.
def dqn_reference(params, state):
    def conv(x, w, b, s):
        y = jax.lax.conv_general_dilated(
            x, w, (s, s), "VALID", dimension_numbers=("NCHW", "OIHW", "NCHW")
        )
        return jax.nn.relu(y + b[None, :, None, None])

    x = conv(state, params["conv1_w"], params["conv1_b"], 4)
    x = conv(x, params["conv2_w"], params["conv2_b"], 2)
    x = conv(x, params["conv3_w"], params["conv3_b"], 1)
    x = x.reshape(x.shape[0], -1)
    x = jax.nn.relu(x @ params["fc1_w"].T + params["fc1_b"])
    return x @ params["fc2_w"].T + params["fc2_b"]


# TODO(synk): RMSprop optimizer, MSELoss, and .to(device) are training/runtime
# plumbing with no forward-pass semantics; only forward() is implemented here.

if __name__ == "__main__":
    key = jax.random.PRNGKey(0)
    k_param, k_state = jax.random.split(key)

    # Small-but-valid shapes for the 8/4/3 conv stack: 36x36 -> 8x8 -> 3x3 -> 1x1
    batch = 2
    input_dims = (4, 36, 36)
    n_actions = 6

    params, conv3_hw, fc_in = init_dqn_params(k_param, n_actions, input_dims)
    state = jax.random.normal(k_state, (batch,) + input_dims, dtype=jnp.float32)

    ref = dqn_reference(params, state)

    # 1) f32 MXU inputs: exact-parity check against the XLA f32 reference.
    prep_f32 = prepare_params(params, conv3_hw, mxu_dtype=jnp.float32)
    q_f32 = jax.block_until_ready(dqn_forward(prep_f32, state, n_actions=n_actions))
    assert q_f32.shape == (batch, n_actions), q_f32.shape
    err_f32 = float(jnp.max(jnp.abs(q_f32 - ref)))
    assert jnp.allclose(q_f32, ref, rtol=2e-3, atol=2e-3), err_f32

    # 2) bf16 MXU inputs (v5e/v6e/v7x fast path): f32 accumulation/bias/ReLU,
    #    looser tolerance to account for bf16 operand rounding.
    prep_bf16 = prepare_params(params, conv3_hw, mxu_dtype=jnp.bfloat16)
    q_bf16 = jax.block_until_ready(dqn_forward(prep_bf16, state, n_actions=n_actions))
    assert q_bf16.shape == (batch, n_actions), q_bf16.shape
    err_bf16 = float(jnp.max(jnp.abs(q_bf16 - ref)))
    assert jnp.allclose(q_bf16, ref, rtol=5e-2, atol=5e-2), err_bf16

    print("KERNEL_OK")
</pallas_src>

<mosaic_0001>
module attributes {stable_mosaic.version = 11 : i64} {
  func.func @_conv_relu_kernel(%arg0: i32, %arg1: memref<2x9x9x64xf32, #tpu.memory_space<vmem>>, %arg2: memref<256x32xf32, #tpu.memory_space<vmem>>, %arg3: memref<1x32xf32, #tpu.memory_space<vmem>>, %arg4: memref<2x8x8x32xf32, #tpu.memory_space<vmem>>) attributes {dimension_semantics = [#tpu.dimension_semantics<parallel>], iteration_bounds = array<i64: 1>, scalar_prefetch = 0 : i64, scratch_operands = 0 : i64, tpu.core_type = #tpu.core_type<tc>, window_params = [{transform_indices = @transform_0, window_bounds = array<i64: 2, 9, 9, 64>}, {pipeline_mode = #tpu.pipeline_mode<synchronous>, transform_indices = @transform_1, window_bounds = array<i64: 256, 32>}, {pipeline_mode = #tpu.pipeline_mode<synchronous>, transform_indices = @transform_2, window_bounds = array<i64: 1, 32>}, {transform_indices = @transform_3, window_bounds = array<i64: 2, 8, 8, 32>}]} {
    %c0 = arith.constant 0 : index
    %c0_0 = arith.constant 0 : index
    %c0_1 = arith.constant 0 : index
    %c0_2 = arith.constant 0 : index
    %0 = vector.load %arg1[%c0, %c0_0, %c0_1, %c0_2] : memref<2x9x9x64xf32, #tpu.memory_space<vmem>>, vector<2x8x8x64xf32>
    %c0_3 = arith.constant 0 : index
    %c0_4 = arith.constant 0 : index
    %c1 = arith.constant 1 : index
    %c0_5 = arith.constant 0 : index
    %1 = vector.load %arg1[%c0_3, %c0_4, %c1, %c0_5] : memref<2x9x9x64xf32, #tpu.memory_space<vmem>>, vector<2x8x8x64xf32>
    %c0_6 = arith.constant 0 : index
    %c1_7 = arith.constant 1 : index
    %c0_8 = arith.constant 0 : index
    %c0_9 = arith.constant 0 : index
    %2 = vector.load %arg1[%c0_6, %c1_7, %c0_8, %c0_9] : memref<2x9x9x64xf32, #tpu.memory_space<vmem>>, vector<2x8x8x64xf32>
    %c0_10 = arith.constant 0 : index
    %c1_11 = arith.constant 1 : index
    %c1_12 = arith.constant 1 : index
    %c0_13 = arith.constant 0 : index
    %3 = vector.load %arg1[%c0_10, %c1_11, %c1_12, %c0_13] : memref<2x9x9x64xf32, #tpu.memory_space<vmem>>, vector<2x8x8x64xf32>
    %4 = tpu.concatenate %0, %1, %2, %3 in 3 : vector<2x8x8x64xf32>, vector<2x8x8x64xf32>, vector<2x8x8x64xf32>, vector<2x8x8x64xf32> -> vector<2x8x8x256xf32>
    %5 = vector.shape_cast %4 : vector<2x8x8x256xf32> to vector<128x256xf32>
    %c0_14 = arith.constant 0 : index
    %c0_15 = arith.constant 0 : index
    %6 = vector.load %arg2[%c0_14, %c0_15] : memref<256x32xf32, #tpu.memory_space<vmem>>, vector<256x32xf32>
    %cst = arith.constant dense<0.000000e+00> : vector<128x32xf32>
    %7 = tpu.matmul %5, %6, %cst {dimension_numbers = #tpu.dot_dimension_numbers<[1], [0], [0], [1], [0, 0, 1, 1], [], []>} : vector<128x256xf32>, vector<256x32xf32>, vector<128x32xf32> -> vector<128x32xf32>
    %c0_16 = arith.constant 0 : index
    %c0_17 = arith.constant 0 : index
    %8 = vector.load %arg3[%c0_16, %c0_17] : memref<1x32xf32, #tpu.memory_space<vmem>>, vector<1x32xf32>
    %9 = vector.broadcast %8 : vector<1x32xf32> to vector<128x32xf32>
    %10 = arith.addf %7, %9 : vector<128x32xf32>
    %cst_18 = arith.constant 0.000000e+00 : f32
    %11 = vector.broadcast %cst_18 : f32 to vector<128x32xf32>
    %12 = arith.maximumf %10, %11 : vector<128x32xf32>
    %13 = vector.shape_cast %12 : vector<128x32xf32> to vector<2x8x8x32xf32>
    %c0_19 = arith.constant 0 : index
    %c0_20 = arith.constant 0 : index
    %c0_21 = arith.constant 0 : index
    %c0_22 = arith.constant 0 : index
    %14 = vector.load %arg4[%c0_19, %c0_20, %c0_21, %c0_22] : memref<2x8x8x32xf32, #tpu.memory_space<vmem>>, vector<2x8x8x32xf32>
    tpu.vector_store %arg4[%c0_19, %c0_20, %c0_21, %c0_22], %13 {strides = array<i32>} : memref<2x8x8x32xf32, #tpu.memory_space<vmem>>, vector<2x8x8x32xf32>,
    return
  }
  func.func @transform_0(%arg0: i32) -> (i32, i32, i32, i32) {
    %c0_i32 = arith.constant 0 : i32
    %c0_i32_0 = arith.constant 0 : i32
    %c0_i32_1 = arith.constant 0 : i32
    %c0_i32_2 = arith.constant 0 : i32
    return %arg0, %c0_i32, %c0_i32_0, %c0_i32_1 : i32, i32, i32, i32
  }
  func.func @transform_1(%arg0: i32) -> (i32, i32) {
    %c0_i32 = arith.constant 0 : i32
    %c0_i32_0 = arith.constant 0 : i32
    %c0_i32_1 = arith.constant 0 : i32
    return %c0_i32, %c0_i32_0 : i32, i32
  }
  func.func @transform_2(%arg0: i32) -> (i32, i32) {
    %c0_i32 = arith.constant 0 : i32
    %c0_i32_0 = arith.constant 0 : i32
    %c0_i32_1 = arith.constant 0 : i32
    return %c0_i32, %c0_i32_0 : i32, i32
  }
  func.func @transform_3(%arg0: i32) -> (i32, i32, i32, i32) {
    %c0_i32 = arith.constant 0 : i32
    %c0_i32_0 = arith.constant 0 : i32
    %c0_i32_1 = arith.constant 0 : i32
    %c0_i32_2 = arith.constant 0 : i32
    return %arg0, %c0_i32, %c0_i32_0, %c0_i32_1 : i32, i32, i32, i32
  }
}

module attributes {stable_mosaic.version = 11 : i64} {
  func.func @_conv_relu_kernel(%arg0: i32, %arg1: memref<2x4x4x128xf32, #tpu.memory_space<vmem>>, %arg2: memref<512x64xf32, #tpu.memory_space<vmem>>, %arg3: memref<1x64xf32, #tpu.memory_space<vmem>>, %arg4: memref<2x3x3x64xf32, #tpu.memory_space<vmem>>) attributes {dimension_semantics = [#tpu.dimension_semantics<parallel>], iteration_bounds = array<i64: 1>, scalar_prefetch = 0 : i64, scratch_operands = 0 : i64, tpu.core_type = #tpu.core_type<tc>, window_params = [{transform_indices = @transform_0, window_bounds = array<i64: 2, 4, 4, 128>}, {pipeline_mode = #tpu.pipeline_mode<synchronous>, transform_indices = @transform_1, window_bounds = array<i64: 512, 64>}, {pipeline_mode = #tpu.pipeline_mode<synchronous>, transform_indices = @transform_2, window_bounds = array<i64: 1, 64>}, {transform_indices = @transform_3, window_bounds = array<i64: 2, 3, 3, 64>}]} {
    %c0 = arith.constant 0 : index
    %c0_0 = arith.constant 0 : index
    %c0_1 = arith.constant 0 : index
    %c0_2 = arith.constant 0 : index
    %0 = vector.load %arg1[%c0, %c0_0, %c0_1, %c0_2] : memref<2x4x4x128xf32, #tpu.memory_space<vmem>>, vector<2x3x3x128xf32>
    %c0_3 = arith.constant 0 : index
    %c0_4 = arith.constant 0 : index
    %c1 = arith.constant 1 : index
    %c0_5 = arith.constant 0 : index
    %1 = vector.load %arg1[%c0_3, %c0_4, %c1, %c0_5] : memref<2x4x4x128xf32, #tpu.memory_space<vmem>>, vector<2x3x3x128xf32>
    %c0_6 = arith.constant 0 : index
    %c1_7 = arith.constant 1 : index
    %c0_8 = arith.constant 0 : index
    %c0_9 = arith.constant 0 : index
    %2 = vector.load %arg1[%c0_6, %c1_7, %c0_8, %c0_9] : memref<2x4x4x128xf32, #tpu.memory_space<vmem>>, vector<2x3x3x128xf32>
    %c0_10 = arith.constant 0 : index
    %c1_11 = arith.constant 1 : index
    %c1_12 = arith.constant 1 : index
    %c0_13 = arith.constant 0 : index
    %3 = vector.load %arg1[%c0_10, %c1_11, %c1_12, %c0_13] : memref<2x4x4x128xf32, #tpu.memory_space<vmem>>, vector<2x3x3x128xf32>
    %4 = tpu.concatenate %0, %1, %2, %3 in 3 : vector<2x3x3x128xf32>, vector<2x3x3x128xf32>, vector<2x3x3x128xf32>, vector<2x3x3x128xf32> -> vector<2x3x3x512xf32>
    %5 = vector.shape_cast %4 : vector<2x3x3x512xf32> to vector<18x512xf32>
    %c0_14 = arith.constant 0 : index
    %c0_15 = arith.constant 0 : index
    %6 = vector.load %arg2[%c0_14, %c0_15] : memref<512x64xf32, #tpu.memory_space<vmem>>, vector<512x64xf32>
    %cst = arith.constant dense<0.000000e+00> : vector<18x64xf32>
    %7 = tpu.matmul %5, %6, %cst {dimension_numbers = #tpu.dot_dimension_numbers<[1], [0], [0], [1], [0, 0, 1, 1], [], []>} : vector<18x512xf32>, vector<512x64xf32>, vector<18x64xf32> -> vector<18x64xf32>
    %c0_16 = arith.constant 0 : index
    %c0_17 = arith.constant 0 : index
    %8 = vector.load %arg3[%c0_16, %c0_17] : memref<1x64xf32, #tpu.memory_space<vmem>>, vector<1x64xf32>
    %9 = vector.broadcast %8 : vector<1x64xf32> to vector<18x64xf32>
    %10 = arith.addf %7, %9 : vector<18x64xf32>
    %cst_18 = arith.constant 0.000000e+00 : f32
    %11 = vector.broadcast %cst_18 : f32 to vector<18x64xf32>
    %12 = arith.maximumf %10, %11 : vector<18x64xf32>
    %13 = vector.shape_cast %12 : vector<18x64xf32> to vector<2x3x3x64xf32>
    %c0_19 = arith.constant 0 : index
    %c0_20 = arith.constant 0 : index
    %c0_21 = arith.constant 0 : index
    %c0_22 = arith.constant 0 : index
    %14 = vector.load %arg4[%c0_19, %c0_20, %c0_21, %c0_22] : memref<2x3x3x64xf32, #tpu.memory_space<vmem>>, vector<2x3x3x64xf32>
    tpu.vector_store %arg4[%c0_19, %c0_20, %c0_21, %c0_22], %13 {strides = array<i32>} : memref<2x3x3x64xf32, #tpu.memory_space<vmem>>, vector<2x3x3x64xf32>,
    return
  }
  func.func @transform_0(%arg0: i32) -> (i32, i32, i32, i32) {
    %c0_i32 = arith.constant 0 : i32
    %c0_i32_0 = arith.constant 0 : i32
    %c0_i32_1 = arith.constant 0 : i32
    %c0_i32_2 = arith.constant 0 : i32
    return %arg0, %c0_i32, %c0_i32_0, %c0_i32_1 : i32, i32, i32, i32
  }
  func.func @transform_1(%arg0: i32) -> (i32, i32) {
    %c0_i32 = arith.constant 0 : i32
    %c0_i32_0 = arith.constant 0 : i32
    %c0_i32_1 = arith.constant 0 : i32
    return %c0_i32, %c0_i32_0 : i32, i32
  }
  func.func @transform_2(%arg0: i32) -> (i32, i32) {
    %c0_i32 = arith.constant 0 : i32
    %c0_i32_0 = arith.constant 0 : i32
    %c0_i32_1 = arith.constant 0 : i32
    return %c0_i32, %c0_i32_0 : i32, i32
  }
  func.func @transform_3(%arg0: i32) -> (i32, i32, i32, i32) {
    %c0_i32 = arith.constant 0 : i32
    %c0_i32_0 = arith.constant 0 : i32
    %c0_i32_1 = arith.constant 0 : i32
    %c0_i32_2 = arith.constant 0 : i32
    return %arg0, %c0_i32, %c0_i32_0, %c0_i32_1 : i32, i32, i32, i32
  }
}

module attributes {stable_mosaic.version = 11 : i64} {
  func.func @_conv_relu_kernel(%arg0: i32, %arg1: memref<2x3x3x64xf32, #tpu.memory_space<vmem>>, %arg2: memref<576x64xf32, #tpu.memory_space<vmem>>, %arg3: memref<1x64xf32, #tpu.memory_space<vmem>>, %arg4: memref<2x1x1x64xf32, #tpu.memory_space<vmem>>) attributes {dimension_semantics = [#tpu.dimension_semantics<parallel>], iteration_bounds = array<i64: 1>, scalar_prefetch = 0 : i64, scratch_operands = 0 : i64, tpu.core_type = #tpu.core_type<tc>, window_params = [{transform_indices = @transform_0, window_bounds = array<i64: 2, 3, 3, 64>}, {pipeline_mode = #tpu.pipeline_mode<synchronous>, transform_indices = @transform_1, window_bounds = array<i64: 576, 64>}, {pipeline_mode = #tpu.pipeline_mode<synchronous>, transform_indices = @transform_2, window_bounds = array<i64: 1, 64>}, {transform_indices = @transform_3, window_bounds = array<i64: 2, 1, 1, 64>}]} {
    %c0 = arith.constant 0 : index
    %c0_0 = arith.constant 0 : index
    %c0_1 = arith.constant 0 : index
    %c0_2 = arith.constant 0 : index
    %0 = vector.load %arg1[%c0, %c0_0, %c0_1, %c0_2] : memref<2x3x3x64xf32, #tpu.memory_space<vmem>>, vector<2x1x1x64xf32>
    %c0_3 = arith.constant 0 : index
    %c0_4 = arith.constant 0 : index
    %c1 = arith.constant 1 : index
    %c0_5 = arith.constant 0 : index
    %1 = vector.load %arg1[%c0_3, %c0_4, %c1, %c0_5] : memref<2x3x3x64xf32, #tpu.memory_space<vmem>>, vector<2x1x1x64xf32>
    %c0_6 = arith.constant 0 : index
    %c0_7 = arith.constant 0 : index
    %c2 = arith.constant 2 : index
    %c0_8 = arith.constant 0 : index
    %2 = vector.load %arg1[%c0_6, %c0_7, %c2, %c0_8] : memref<2x3x3x64xf32, #tpu.memory_space<vmem>>, vector<2x1x1x64xf32>
    %c0_9 = arith.constant 0 : index
    %c1_10 = arith.constant 1 : index
    %c0_11 = arith.constant 0 : index
    %c0_12 = arith.constant 0 : index
    %3 = vector.load %arg1[%c0_9, %c1_10, %c0_11, %c0_12] : memref<2x3x3x64xf32, #tpu.memory_space<vmem>>, vector<2x1x1x64xf32>
    %c0_13 = arith.constant 0 : index
    %c1_14 = arith.constant 1 : index
    %c1_15 = arith.constant 1 : index
    %c0_16 = arith.constant 0 : index
    %4 = vector.load %arg1[%c0_13, %c1_14, %c1_15, %c0_16] : memref<2x3x3x64xf32, #tpu.memory_space<vmem>>, vector<2x1x1x64xf32>
    %c0_17 = arith.constant 0 : index
    %c1_18 = arith.constant 1 : index
    %c2_19 = arith.constant 2 : index
    %c0_20 = arith.constant 0 : index
    %5 = vector.load %arg1[%c0_17, %c1_18, %c2_19, %c0_20] : memref<2x3x3x64xf32, #tpu.memory_space<vmem>>, vector<2x1x1x64xf32>
    %c0_21 = arith.constant 0 : index
    %c2_22 = arith.constant 2 : index
    %c0_23 = arith.constant 0 : index
    %c0_24 = arith.constant 0 : index
    %6 = vector.load %arg1[%c0_21, %c2_22, %c0_23, %c0_24] : memref<2x3x3x64xf32, #tpu.memory_space<vmem>>, vector<2x1x1x64xf32>
    %c0_25 = arith.constant 0 : index
    %c2_26 = arith.constant 2 : index
    %c1_27 = arith.constant 1 : index
    %c0_28 = arith.constant 0 : index
    %7 = vector.load %arg1[%c0_25, %c2_26, %c1_27, %c0_28] : memref<2x3x3x64xf32, #tpu.memory_space<vmem>>, vector<2x1x1x64xf32>
    %c0_29 = arith.constant 0 : index
    %c2_30 = arith.constant 2 : index
    %c2_31 = arith.constant 2 : index
    %c0_32 = arith.constant 0 : index
    %8 = vector.load %arg1[%c0_29, %c2_30, %c2_31, %c0_32] : memref<2x3x3x64xf32, #tpu.memory_space<vmem>>, vector<2x1x1x64xf32>
    %9 = tpu.concatenate %0, %1, %2, %3, %4, %5, %6, %7, %8 in 3 : vector<2x1x1x64xf32>, vector<2x1x1x64xf32>, vector<2x1x1x64xf32>, vector<2x1x1x64xf32>, vector<2x1x1x64xf32>, vector<2x1x1x64xf32>, vector<2x1x1x64xf32>, vector<2x1x1x64xf32>, vector<2x1x1x64xf32> -> vector<2x1x1x576xf32>
    %10 = vector.shape_cast %9 : vector<2x1x1x576xf32> to vector<2x576xf32>
    %c0_33 = arith.constant 0 : index
    %c0_34 = arith.constant 0 : index
    %11 = vector.load %arg2[%c0_33, %c0_34] : memref<576x64xf32, #tpu.memory_space<vmem>>, vector<576x64xf32>
    %cst = arith.constant dense<0.000000e+00> : vector<2x64xf32>
    %12 = tpu.matmul %10, %11, %cst {dimension_numbers = #tpu.dot_dimension_numbers<[1], [0], [0], [1], [0, 0, 1, 1], [], []>} : vector<2x576xf32>, vector<576x64xf32>, vector<2x64xf32> -> vector<2x64xf32>
    %c0_35 = arith.constant 0 : index
    %c0_36 = arith.constant 0 : index
    %13 = vector.load %arg3[%c0_35, %c0_36] : memref<1x64xf32, #tpu.memory_space<vmem>>, vector<1x64xf32>
    %14 = vector.broadcast %13 : vector<1x64xf32> to vector<2x64xf32>
    %15 = arith.addf %12, %14 : vector<2x64xf32>
    %cst_37 = arith.constant 0.000000e+00 : f32
    %16 = vector.broadcast %cst_37 : f32 to vector<2x64xf32>
    %17 = arith.maximumf %15, %16 : vector<2x64xf32>
    %18 = vector.shape_cast %17 : vector<2x64xf32> to vector<2x1x1x64xf32>
    %c0_38 = arith.constant 0 : index
    %c0_39 = arith.constant 0 : index
    %c0_40 = arith.constant 0 : index
    %c0_41 = arith.constant 0 : index
    %19 = vector.load %arg4[%c0_38, %c0_39, %c0_40, %c0_41] : memref<2x1x1x64xf32, #tpu.memory_space<vmem>>, vector<2x1x1x64xf32>
    tpu.vector_store %arg4[%c0_38, %c0_39, %c0_40, %c0_41], %18 {strides = array<i32>} : memref<2x1x1x64xf32, #tpu.memory_space<vmem>>, vector<2x1x1x64xf32>,
    return
  }
  func.func @transform_0(%arg0: i32) -> (i32, i32, i32, i32) {
    %c0_i32 = arith.constant 0 : i32
    %c0_i32_0 = arith.constant 0 : i32
    %c0_i32_1 = arith.constant 0 : i32
    %c0_i32_2 = arith.constant 0 : i32
    return %arg0, %c0_i32, %c0_i32_0, %c0_i32_1 : i32, i32, i32, i32
  }
  func.func @transform_1(%arg0: i32) -> (i32, i32) {
    %c0_i32 = arith.constant 0 : i32
    %c0_i32_0 = arith.constant 0 : i32
    %c0_i32_1 = arith.constant 0 : i32
    return %c0_i32, %c0_i32_0 : i32, i32
  }
  func.func @transform_2(%arg0: i32) -> (i32, i32) {
    %c0_i32 = arith.constant 0 : i32
    %c0_i32_0 = arith.constant 0 : i32
    %c0_i32_1 = arith.constant 0 : i32
    return %c0_i32, %c0_i32_0 : i32, i32
  }
  func.func @transform_3(%arg0: i32) -> (i32, i32, i32, i32) {
    %c0_i32 = arith.constant 0 : i32
    %c0_i32_0 = arith.constant 0 : i32
    %c0_i32_1 = arith.constant 0 : i32
    %c0_i32_2 = arith.constant 0 : i32
    return %arg0, %c0_i32, %c0_i32_0, %c0_i32_1 : i32, i32, i32, i32
  }
}

module attributes {stable_mosaic.version = 11 : i64} {
  func.func @_mlp_kernel(%arg0: i32, %arg1: memref<2x64xf32, #tpu.memory_space<vmem>>, %arg2: memref<64x512xf32, #tpu.memory_space<vmem>>, %arg3: memref<1x512xf32, #tpu.memory_space<vmem>>, %arg4: memref<512x128xf32, #tpu.memory_space<vmem>>, %arg5: memref<1x128xf32, #tpu.memory_space<vmem>>, %arg6: memref<2x128xf32, #tpu.memory_space<vmem>>) attributes {dimension_semantics = [#tpu.dimension_semantics<parallel>], iteration_bounds = array<i64: 1>, scalar_prefetch = 0 : i64, scratch_operands = 0 : i64, tpu.core_type = #tpu.core_type<tc>, window_params = [{transform_indices = @transform_0, window_bounds = array<i64: 2, 64>}, {pipeline_mode = #tpu.pipeline_mode<synchronous>, transform_indices = @transform_1, window_bounds = array<i64: 64, 512>}, {pipeline_mode = #tpu.pipeline_mode<synchronous>, transform_indices = @transform_2, window_bounds = array<i64: 1, 512>}, {pipeline_mode = #tpu.pipeline_mode<synchronous>, transform_indices = @transform_3, window_bounds = array<i64: 512, 128>}, {pipeline_mode = #tpu.pipeline_mode<synchronous>, transform_indices = @transform_4, window_bounds = array<i64: 1, 128>}, {transform_indices = @transform_5, window_bounds = array<i64: 2, 128>}]} {
    %c0 = arith.constant 0 : index
    %c0_0 = arith.constant 0 : index
    %0 = vector.load %arg1[%c0, %c0_0] : memref<2x64xf32, #tpu.memory_space<vmem>>, vector<2x64xf32>
    %c0_1 = arith.constant 0 : index
    %c0_2 = arith.constant 0 : index
    %1 = vector.load %arg2[%c0_1, %c0_2] : memref<64x512xf32, #tpu.memory_space<vmem>>, vector<64x512xf32>
    %cst = arith.constant dense<0.000000e+00> : vector<2x512xf32>
    %2 = tpu.matmul %0, %1, %cst {dimension_numbers = #tpu.dot_dimension_numbers<[1], [0], [0], [1], [0, 0, 1, 1], [], []>} : vector<2x64xf32>, vector<64x512xf32>, vector<2x512xf32> -> vector<2x512xf32>
    %c0_3 = arith.constant 0 : index
    %c0_4 = arith.constant 0 : index
    %3 = vector.load %arg3[%c0_3, %c0_4] : memref<1x512xf32, #tpu.memory_space<vmem>>, vector<1x512xf32>
    %4 = vector.broadcast %3 : vector<1x512xf32> to vector<2x512xf32>
    %5 = arith.addf %2, %4 : vector<2x512xf32>
    %cst_5 = arith.constant 0.000000e+00 : f32
    %6 = vector.broadcast %cst_5 : f32 to vector<2x512xf32>
    %7 = arith.maximumf %5, %6 : vector<2x512xf32>
    %c0_6 = arith.constant 0 : index
    %c0_7 = arith.constant 0 : index
    %8 = vector.load %arg4[%c0_6, %c0_7] : memref<512x128xf32, #tpu.memory_space<vmem>>, vector<512x128xf32>
    %cst_8 = arith.constant dense<0.000000e+00> : vector<2x128xf32>
    %9 = tpu.matmul %7, %8, %cst_8 {dimension_numbers = #tpu.dot_dimension_numbers<[1], [0], [0], [1], [0, 0, 1, 1], [], []>} : vector<2x512xf32>, vector<512x128xf32>, vector<2x128xf32> -> vector<2x128xf32>
    %c0_9 = arith.constant 0 : index
    %c0_10 = arith.constant 0 : index
    %10 = vector.load %arg5[%c0_9, %c0_10] : memref<1x128xf32, #tpu.memory_space<vmem>>, vector<1x128xf32>
    %11 = vector.broadcast %10 : vector<1x128xf32> to vector<2x128xf32>
    %12 = arith.addf %9, %11 : vector<2x128xf32>
    %c0_11 = arith.constant 0 : index
    %c0_12 = arith.constant 0 : index
    %13 = vector.load %arg6[%c0_11, %c0_12] : memref<2x128xf32, #tpu.memory_space<vmem>>, vector<2x128xf32>
    tpu.vector_store %arg6[%c0_11, %c0_12], %12 {strides = array<i32>} : memref<2x128xf32, #tpu.memory_space<vmem>>, vector<2x128xf32>,
    return
  }
  func.func @transform_0(%arg0: i32) -> (i32, i32) {
    %c0_i32 = arith.constant 0 : i32
    %c0_i32_0 = arith.constant 0 : i32
    return %arg0, %c0_i32 : i32, i32
  }
  func.func @transform_1(%arg0: i32) -> (i32, i32) {
    %c0_i32 = arith.constant 0 : i32
    %c0_i32_0 = arith.constant 0 : i32
    %c0_i32_1 = arith.constant 0 : i32
    return %c0_i32, %c0_i32_0 : i32, i32
  }
  func.func @transform_2(%arg0: i32) -> (i32, i32) {
    %c0_i32 = arith.constant 0 : i32
    %c0_i32_0 = arith.constant 0 : i32
    %c0_i32_1 = arith.constant 0 : i32
    return %c0_i32, %c0_i32_0 : i32, i32
  }
  func.func @transform_3(%arg0: i32) -> (i32, i32) {
    %c0_i32 = arith.constant 0 : i32
    %c0_i32_0 = arith.constant 0 : i32
    %c0_i32_1 = arith.constant 0 : i32
    return %c0_i32, %c0_i32_0 : i32, i32
  }
  func.func @transform_4(%arg0: i32) -> (i32, i32) {
    %c0_i32 = arith.constant 0 : i32
    %c0_i32_0 = arith.constant 0 : i32
    %c0_i32_1 = arith.constant 0 : i32
    return %c0_i32, %c0_i32_0 : i32, i32
  }
  func.func @transform_5(%arg0: i32) -> (i32, i32) {
    %c0_i32 = arith.constant 0 : i32
    %c0_i32_0 = arith.constant 0 : i32
    return %arg0, %c0_i32 : i32, i32
  }
}

</mosaic_0001>

<bundles_post_ra>
// kernel: dqn_forward.4
= control target key start
LH: loop header
LB: loop body
LE: loop exit
PB: predicated region body
PF: predicated region fallthrough
CT: control target
= control target key end

     0   :  { %s703_s24 = smov 64   ;;  %vm207_vm0 = vcmask 523264   ;;  %vm440_vm1 = vcmask 261120   ;;  %s1061_s0 = inlined_call_operand.vmem [shape: f32[2,9,9,64], index: 0, kind: input, shape index: {}]   ;;  %s1062_s1 = inlined_call_operand.vmem [shape: f32[256,32], index: 1, kind: input, shape index: {}]   ;;  %s1063_s2 = inlined_call_operand.vmem [shape: f32[1,32], index: 2, kind: input, shape index: {}]   ;;  %s1064_s3 = inlined_call_operand.vmem [shape: f32[2,8,8,32], index: 3, kind: output, shape index: {}]  }
   0x1   :  { %v477_v0 = vld [vmem:[%s1061_s0 + $0x11] sm:$0xff]  ;;  %v485_v1 = vld [vmem:[%s1061_s0 + $0xa1] sm:$0xff] }
   0x2   :  { %v478_v2 = vld [vmem:[%s1061_s0 + $0x21] sm:$0xff]  ;;  %v623_v3 = vpack.i.bf16 %v485_v1, %v477_v0  ;;  %v486_v4 = vld [vmem:[%s1061_s0 + $0xb1] sm:$0xff] }
   0x3   :  { %v30_v5 = vld [vmem:[%s1061_s0 + $0x1] sm:$0xff]  ;;  %v38_v6 = vld [vmem:[%s1061_s0 + $0x91] sm:$0xff]  ;;  %v633_v7 = vpack.i.bf16 %v486_v4, %v478_v2 }
   0x4   :  { %624 = vrot.lane.b32.xlu0 %v623_v3, %s703_s24  ;;  %v628_v8 = vpack.i.bf16 %v38_v6, %v30_v5  ;;  %v479_v9 = vld [vmem:[%s1061_s0 + $0x31] sm:$0xff]  ;;  %v487_v10 = vld [vmem:[%s1061_s0 + $0xc1] sm:$0xff] }
   0x5   :  { %634 = vrot.lane.b32.xlu1 %v633_v7, %s703_s24  ;;  %v480_v11 = vld [vmem:[%s1061_s0 + $0x41] sm:$0xff]  ;;  %v488_v12 = vld [vmem:[%s1061_s0 + $0xd1] sm:$0xff]  ;;  %v643_v16 = vpack.i.bf16 %v487_v10, %v479_v9 }
   0x6   :  { %v256_v13 = vld [vmem:[%s1062_s1 + $0x80] sm:$0xff]  ;;  %v257_v14 = vld [vmem:[%s1062_s1 + $0x88] sm:$0xff]  ;;  %v258_v19 = vld [vmem:[%s1062_s1 + $0x90] sm:$0xff]  ;;  %v653_v28 = vpack.i.bf16 %v488_v12, %v480_v11 }
   0x7   :  { %v240_v15 = vld [vmem:[%s1062_s1] sm:$0xff]  ;;  %v574_v17 = vpack.c.bf16 %v257_v14, %v256_v13  ;;  %v241_v18 = vld [vmem:[%s1062_s1 + $0x8] sm:$0xff]  ;;  %v259_v20 = vld [vmem:[%s1062_s1 + $0x98] sm:$0xff] }
   0x8   :  { %629 = vrot.lane.b32.xlu0 %v628_v8, %s703_s24  ;;  %v576_v21 = vpack.c.bf16 %v241_v18, %v240_v15  ;;  %v578_v22 = vpack.c.bf16 %v259_v20, %v258_v19  ;;  %v242_v23 = vld [vmem:[%s1062_s1 + $0x10] sm:$0xff]  ;;  %v243_v24 = vld [vmem:[%s1062_s1 + $0x18] sm:$0xff]  ;;  %v260_v25 = vld [vmem:[%s1062_s1 + $0xa0] sm:$0xff] }
   0x9   :  { %639 = vrot.lane.b32.xlu1 %v623_v3, %s703_s24  ;;  %575 = vmatprep.subr.bf16.mxu0 %v574_v17  ;;  %v261_v26 = vld [vmem:[%s1062_s1 + $0xa8] sm:$0xff]  ;;  %v580_v27 = vpack.c.bf16 %v243_v24, %v242_v23  ;;  %v481_v29 = vld [vmem:[%s1061_s0 + $0x51] sm:$0xff]  ;;  %v244_v31 = vld [vmem:[%s1062_s1 + $0x20] sm:$0xff] }
   0xa   :  { %606 = vmatprep.subr.bf16.mxu1 %v574_v17  ;;  %577 = vmatpush3.bf16.msra.mxu0 %v576_v21  ;;  %v582_v30 = vpack.c.bf16 %v261_v26, %v260_v25  ;;  %v245_v32 = vld [vmem:[%s1062_s1 + $0x28] sm:$0xff]  ;;  %v262_v34 = vld [vmem:[%s1062_s1 + $0xb0] sm:$0xff]  ;;  %v263_v35 = vld [vmem:[%s1062_s1 + $0xb8] sm:$0xff] }
   0xb   :  { %614 = vmatpush3.bf16.msra.mxu1 %v576_v21  ;;  %579 = vmatprep.subr.bf16.mxu0 %v578_v22  ;;  %v489_v33 = vld [vmem:[%s1061_s0 + $0xe1] sm:$0xff]  ;;  %v584_v36 = vpack.c.bf16 %v245_v32, %v244_v31  ;;  %v586_v39 = vpack.c.bf16 %v263_v35, %v262_v34  ;;  %v246_v40 = vld [vmem:[%s1062_s1 + $0x30] sm:$0xff]  ;;  %v247_v41 = vld [vmem:[%s1062_s1 + $0x38] sm:$0xff] }
   0xc   :  { %644 = vrot.lane.b32.xlu0 %v643_v16, %s703_s24  ;;  %607 = vmatprep.subr.bf16.mxu1 %v578_v22  ;;  %v663_v37 = vpack.i.bf16 %v489_v33, %v481_v29  ;;  %v482_v38 = vld [vmem:[%s1061_s0 + $0x61] sm:$0xff]  ;;  %v490_v42 = vld [vmem:[%s1061_s0 + $0xf1] sm:$0xff]  ;;  %v588_v45 = vpack.c.bf16 %v247_v41, %v246_v40 }
   0xd   :  { %649 = vrot.lane.b32.xlu1 %v633_v7, %s703_s24  ;;  %v264_v43 = vld [vmem:[%s1062_s1 + $0xc0] sm:$0xff]  ;;  %v265_v44 = vld [vmem:[%s1062_s1 + $0xc8] sm:$0xff]  ;;  %v673_v46 = vpack.i.bf16 %v490_v42, %v482_v38  ;;  %v483_v47 = vld [vmem:[%s1061_s0 + $0x71] sm:$0xff] }
   0xe   :  { %581 = vmatpush3.bf16.msra.mxu0 %v580_v27  ;;  %v590_v48 = vpack.c.bf16 %v265_v44, %v264_v43  ;;  %v248_v49 = vld [vmem:[%s1062_s1 + $0x40] sm:$0xff]  ;;  %v249_v50 = vld [vmem:[%s1062_s1 + $0x48] sm:$0xff]  ;;  %v266_v52 = vld [vmem:[%s1062_s1 + $0xd0] sm:$0xff] }
   0xf   :  { %615 = vmatpush3.bf16.msra.mxu1 %v580_v27  ;;  %583 = vmatprep.subr.bf16.mxu0 %v582_v30  ;;  %v491_v51 = vld [vmem:[%s1061_s0 + $0x101] sm:$0xff]  ;;  %v267_v53 = vld [vmem:[%s1062_s1 + $0xd8] sm:$0xff]  ;;  %v592_v54 = vpack.c.bf16 %v249_v50, %v248_v49  ;;  %v250_v58 = vld [vmem:[%s1062_s1 + $0x50] sm:$0xff] }
  0x10   :  { %654 = vrot.lane.b32.xlu0 %v653_v28, %s703_s24  ;;  %608 = vmatprep.subr.bf16.mxu1 %v582_v30  ;;  %v683_v55 = vpack.i.bf16 %v491_v51, %v483_v47  ;;  %v484_v56 = vld [vmem:[%s1061_s0 + $0x81] sm:$0xff]  ;;  %v594_v57 = vpack.c.bf16 %v267_v53, %v266_v52  ;;  %v251_v59 = vld [vmem:[%s1062_s1 + $0x58] sm:$0xff]  ;;  %v270_v4 = vld [vmem:[%s1062_s1 + $0xf0] sm:$0xff] }
  0x11   :  { %659 = vrot.lane.b32.xlu1 %v643_v16, %s703_s24  ;;  %v492_v60 = vld [vmem:[%s1061_s0 + $0x111] sm:$0xff]  ;;  %v268_v61 = vld [vmem:[%s1062_s1 + $0xe0] sm:$0xff]  ;;  %v269_v62 = vld [vmem:[%s1062_s1 + $0xe8] sm:$0xff]  ;;  %v596_v63 = vpack.c.bf16 %v251_v59, %v250_v58 }
  0x12   :  { %585 = vmatpush3.bf16.msra.mxu0 %v584_v36  ;;  %v693_v0 = vpack.i.bf16 %v492_v60, %v484_v56  ;;  %v598_v1 = vpack.c.bf16 %v269_v62, %v268_v61  ;;  %v252_v2 = vld [vmem:[%s1062_s1 + $0x60] sm:$0xff]  ;;  %v253_v3 = vld [vmem:[%s1062_s1 + $0x68] sm:$0xff]  ;;  %v271_v5 = vld [vmem:[%s1062_s1 + $0xf8] sm:$0xff] }
  0x13   :  { %616 = vmatpush3.bf16.msra.mxu1 %v584_v36  ;;  %587 = vmatprep.subr.bf16.mxu0 %v586_v39  ;;  %v600_v6 = vpack.c.bf16 %v253_v3, %v252_v2  ;;  %v602_v7 = vpack.c.bf16 %v271_v5, %v270_v4  ;;  %v254_v8 = vld [vmem:[%s1062_s1 + $0x70] sm:$0xff]  ;;  %v255_v9 = vld [vmem:[%s1062_s1 + $0x78] sm:$0xff]  ;;  %v469_v13 = vld [vmem:[%s1061_s0 + $0xa0] sm:$0xff] }
  0x14   :  { %664 = vrot.lane.b32.xlu0 %v663_v37, %s703_s24  ;;  %609 = vmatprep.subr.bf16.mxu1 %v586_v39  ;;  %v604_v10 = vpack.c.bf16 %v255_v9, %v254_v8  ;;  %v461_v12 = vld [vmem:[%s1061_s0 + $0x10] sm:$0xff]  ;;  %v462_v21 = vld [vmem:[%s1061_s0 + $0x20] sm:$0xff] }
  0x15   :  { %669 = vrot.lane.b32.xlu1 %v653_v28, %s703_s24  ;;  %v470_v22 = vld [vmem:[%s1061_s0 + $0xb0] sm:$0xff]  ;;  %v14_v24 = vld [vmem:[%s1061_s0] sm:$0xff] }
  0x16   :  { %589 = vmatpush3.bf16.msra.mxu0 %v588_v45  ;;  %v22_v25 = vld [vmem:[%s1061_s0 + $0x90] sm:$0xff]  ;;  %v473_v61 = vld [vmem:[%s1061_s0 + $0xe0] sm:$0xff] }
  0x17   :  { %617 = vmatpush3.bf16.msra.mxu1 %v588_v45  ;;  %591 = vmatprep.subr.bf16.mxu0 %v590_v48  ;;  %v463_v36 = vld [vmem:[%s1061_s0 + $0x30] sm:$0xff]  ;;  %v466_v8 = vld [vmem:[%s1061_s0 + $0x60] sm:$0xff] }
  0x18   :  { %674 = vrot.lane.b32.xlu0 %v673_v46, %s703_s24  ;;  %610 = vmatprep.subr.bf16.mxu1 %v590_v48  ;;  %v464_v48 = vld [vmem:[%s1061_s0 + $0x40] sm:$0xff]  ;;  %v472_v49 = vld [vmem:[%s1061_s0 + $0xd0] sm:$0xff] }
  0x19   :  { %679 = vrot.lane.b32.xlu1 %v663_v37, %s703_s24  ;;  %v471_v37 = vld [vmem:[%s1061_s0 + $0xc0] sm:$0xff]  ;;  %v465_v60 = vld [vmem:[%s1061_s0 + $0x50] sm:$0xff] }
  0x1a   :  { %593 = vmatpush3.bf16.msra.mxu0 %v592_v54  ;;  %v474_v9 = vld [vmem:[%s1061_s0 + $0xf0] sm:$0xff] }
  0x1b   :  { %618 = vmatpush3.bf16.msra.mxu1 %v592_v54  ;;  %595 = vmatprep.subr.bf16.mxu0 %v594_v57 }
  0x1c   :  { %684 = vrot.lane.b32.xlu0 %v683_v55, %s703_s24  ;;  %611 = vmatprep.subr.bf16.mxu1 %v594_v57 }
  0x1d   :  { %689 = vrot.lane.b32.xlu1 %v673_v46, %s703_s24 }
  0x1e   :  { %597 = vmatpush3.bf16.msra.mxu0 %v596_v63 }
  0x1f   :  { %619 = vmatpush3.bf16.msra.mxu1 %v596_v63  ;;  %599 = vmatprep.subr.bf16.mxu0 %v598_v1 }
  0x20   :  { %694 = vrot.lane.b32.xlu0 %v693_v0, %s703_s24  ;;  %612 = vmatprep.subr.bf16.mxu1 %v598_v1 }
  0x21   :  { %699 = vrot.lane.b32.xlu1 %v683_v55, %s703_s24 }
  0x22   :  { %601 = vmatpush3.bf16.msra.mxu0 %v600_v6 }
  0x23   :  { %620 = vmatpush3.bf16.msra.mxu1 %v600_v6  ;;  %603 = vmatprep.subr.bf16.mxu0 %v602_v7 }
  0x24   :  { %613 = vmatprep.subr.bf16.mxu1 %v602_v7 }
  0x26   :  { %605 = vmatpush3.bf16.msra.mxu0 %v604_v10 }
  0x27   :  { %621 = vmatpush3.bf16.msra.mxu1 %v604_v10 }
  0x76   :  { %v625_v11 = vpop.permute.xlu0 %624 }
  0x77   :  { %v627_v14 = vunpack.i.h.bf16 %v625_v11  ;;  %v626_v15 = vunpack.i.l.bf16 %v625_v11  ;;  %v635_v16 = vpop.permute.xlu1 %634 }
  0x78   :  { %v637_v17 = vunpack.i.h.bf16 %v635_v16  ;;  %v636_v18 = vunpack.i.l.bf16 %v635_v16 }
  0x79   :  { %v224_v19 = vsel %vm207_vm0, %v461_v12, %v626_v15  ;;  %v232_v20 = vsel %vm207_vm0, %v469_v13, %v627_v14 }
  0x7a   :  { %343 = vmatprep.mubr.f32.mxu0 %v224_v19  ;;  %383 = vmatprep.mubr.f32.mxu1 %v232_v20  ;;  %v630_v23 = vpop.permute.xlu0 %629  ;;  %v225_v31 = vsel %vm207_vm0, %v462_v21, %v636_v18  ;;  %v233_v32 = vsel %vm207_vm0, %v470_v22, %v637_v17  ;;  %v467_v20 = vld [vmem:[%s1061_s0 + $0x70] sm:$0xff] }
  0x7b   :  { %v632_v26 = vunpack.i.h.bf16 %v630_v23  ;;  %v631_v27 = vunpack.i.l.bf16 %v630_v23  ;;  %v640_v28 = vpop.permute.xlu1 %639 }
  0x7c   :  { %v642_v29 = vunpack.i.h.bf16 %v640_v28  ;;  %v641_v30 = vunpack.i.l.bf16 %v640_v28 }
  0x7d   :  { %v208_v33 = vsel %vm207_vm0, %v14_v24, %v631_v27  ;;  %v216_v34 = vsel %vm207_vm0, %v22_v25, %v632_v26 }
  0x7e   :  { %344 = vmatmul.mubr.f32.vlgmr.msra.gmra.mrb[0].mxu0 %v208_v33  ;;  %384 = vmatmul.mubr.f32.vlgmr.msra.gmra.mrb[0].mxu1 %v216_v34  ;;  %v645_v35 = vpop.permute.xlu0 %644  ;;  %v209_v41 = vsel %vm207_vm0, %v461_v12, %v641_v30  ;;  %v217_v42 = vsel %vm207_vm0, %v469_v13, %v642_v29  ;;  %v476_v33 = vld [vmem:[%s1061_s0 + $0x110] sm:$0xff] }
  0x7f   :  { %348 = vmatprep.mubr.f32.mxu0 %v225_v31  ;;  %388 = vmatprep.mubr.f32.mxu1 %v233_v32  ;;  %v647_v38 = vunpack.i.h.bf16 %v645_v35  ;;  %v646_v39 = vunpack.i.l.bf16 %v645_v35  ;;  %v650_v40 = vpop.permute.xlu1 %649  ;;  %v468_v32 = vld [vmem:[%s1061_s0 + $0x80] sm:$0xff] }
  0x80   :  { %v652_v43 = vunpack.i.h.bf16 %v650_v40  ;;  %v651_v44 = vunpack.i.l.bf16 %v650_v40 }
  0x81   :  { %v226_v45 = vsel %vm207_vm0, %v463_v36, %v646_v39  ;;  %v234_v46 = vsel %vm207_vm0, %v471_v37, %v647_v38 }
  0x82   :  { %349 = vmatmul.mubr.f32.gmra.mrb[2].mxu0 %v209_v41  ;;  %389 = vmatmul.mubr.f32.gmra.mrb[2].mxu1 %v217_v42  ;;  %v655_v47 = vpop.permute.xlu0 %654  ;;  %v210_v53 = vsel %vm207_vm0, %v462_v21, %v651_v44  ;;  %v218_v54 = vsel %vm207_vm0, %v470_v22, %v652_v43  ;;  %v475_v21 = vld [vmem:[%s1061_s0 + $0x100] sm:$0xff] }
  0x83   :  { %v657_v50 = vunpack.i.h.bf16 %v655_v47  ;;  %v656_v51 = vunpack.i.l.bf16 %v655_v47  ;;  %353 = vmatprep.mubr.f32.mxu0 %v226_v45  ;;  %393 = vmatprep.mubr.f32.mxu1 %v234_v46  ;;  %v660_v52 = vpop.permute.xlu1 %659  ;;  %v979_v47 = vld [vmem:[%s1063_s2] ss:$0 sm:$0xff] }
  0x84   :  { %v662_v55 = vunpack.i.h.bf16 %v660_v52  ;;  %v661_v56 = vunpack.i.l.bf16 %v660_v52 }
  0x85   :  { %v227_v57 = vsel %vm207_vm0, %v464_v48, %v656_v51  ;;  %v235_v58 = vsel %vm207_vm0, %v472_v49, %v657_v50 }
  0x86   :  { %354 = vmatmul.mubr.f32.gmra.mrb[4].mxu0 %v210_v53  ;;  %394 = vmatmul.mubr.f32.gmra.mrb[4].mxu1 %v218_v54  ;;  %v665_v59 = vpop.permute.xlu0 %664  ;;  %v211_v1 = vsel %vm207_vm0, %v463_v36, %v661_v56  ;;  %v219_v2 = vsel %vm207_vm0, %v471_v37, %v662_v55 }
  0x87   :  { %v667_v62 = vunpack.i.h.bf16 %v665_v59  ;;  %v666_v63 = vunpack.i.l.bf16 %v665_v59  ;;  %358 = vmatprep.mubr.f32.mxu0 %v227_v57  ;;  %398 = vmatprep.mubr.f32.mxu1 %v235_v58  ;;  %v670_v0 = vpop.permute.xlu1 %669 }
  0x88   :  { %v672_v3 = vunpack.i.h.bf16 %v670_v0  ;;  %v671_v4 = vunpack.i.l.bf16 %v670_v0 }
  0x89   :  { %v228_v5 = vsel %vm207_vm0, %v465_v60, %v666_v63  ;;  %v236_v6 = vsel %vm207_vm0, %v473_v61, %v667_v62 }
  0x8a   :  { %359 = vmatmul.mubr.f32.gmra.mrb[6].mxu0 %v211_v1  ;;  %399 = vmatmul.mubr.f32.gmra.mrb[6].mxu1 %v219_v2  ;;  %v675_v7 = vpop.permute.xlu0 %674  ;;  %v212_v13 = vsel %vm207_vm0, %v464_v48, %v671_v4  ;;  %v220_v14 = vsel %vm207_vm0, %v472_v49, %v672_v3 }
  0x8b   :  { %v677_v10 = vunpack.i.h.bf16 %v675_v7  ;;  %v676_v11 = vunpack.i.l.bf16 %v675_v7  ;;  %363 = vmatprep.mubr.f32.mxu0 %v228_v5  ;;  %403 = vmatprep.mubr.f32.mxu1 %v236_v6  ;;  %v680_v12 = vpop.permute.xlu1 %679 }
  0x8c   :  { %v682_v15 = vunpack.i.h.bf16 %v680_v12  ;;  %v681_v16 = vunpack.i.l.bf16 %v680_v12 }
  0x8d   :  { %v229_v17 = vsel %vm207_vm0, %v466_v8, %v676_v11  ;;  %v237_v18 = vsel %vm207_vm0, %v474_v9, %v677_v10 }
  0x8e   :  { %364 = vmatmul.mubr.f32.gmra.mrb[8].mxu0 %v212_v13  ;;  %404 = vmatmul.mubr.f32.gmra.mrb[8].mxu1 %v220_v14  ;;  %v685_v19 = vpop.permute.xlu0 %684  ;;  %v213_v25 = vsel %vm207_vm0, %v465_v60, %v681_v16  ;;  %v221_v26 = vsel %vm207_vm0, %v473_v61, %v682_v15 }
  0x8f   :  { %v687_v22 = vunpack.i.h.bf16 %v685_v19  ;;  %v686_v23 = vunpack.i.l.bf16 %v685_v19  ;;  %368 = vmatprep.mubr.f32.mxu0 %v229_v17  ;;  %408 = vmatprep.mubr.f32.mxu1 %v237_v18  ;;  %v690_v24 = vpop.permute.xlu1 %689 }
  0x90   :  { %v692_v27 = vunpack.i.h.bf16 %v690_v24  ;;  %v691_v28 = vunpack.i.l.bf16 %v690_v24 }
  0x91   :  { %v230_v29 = vsel %vm207_vm0, %v467_v20, %v686_v23  ;;  %v238_v30 = vsel %vm207_vm0, %v475_v21, %v687_v22 }
  0x92   :  { %369 = vmatmul.mubr.f32.gmra.mrb[10].mxu0 %v213_v25  ;;  %409 = vmatmul.mubr.f32.gmra.mrb[10].mxu1 %v221_v26  ;;  %v695_v31 = vpop.permute.xlu0 %694  ;;  %v214_v37 = vsel %vm207_vm0, %v466_v8, %v691_v28  ;;  %v222_v38 = vsel %vm207_vm0, %v474_v9, %v692_v27 }
  0x93   :  { %v697_v34 = vunpack.i.h.bf16 %v695_v31  ;;  %v696_v35 = vunpack.i.l.bf16 %v695_v31  ;;  %373 = vmatprep.mubr.f32.mxu0 %v230_v29  ;;  %413 = vmatprep.mubr.f32.mxu1 %v238_v30  ;;  %v700_v36 = vpop.permute.xlu1 %699 }
  0x94   :  { %v702_v39 = vunpack.i.h.bf16 %v700_v36  ;;  %v701_v40 = vunpack.i.l.bf16 %v700_v36 }
  0x95   :  { %v231_v41 = vsel %vm207_vm0, %v468_v32, %v696_v35  ;;  %v239_v42 = vsel %vm207_vm0, %v476_v33, %v697_v34 }
  0x96   :  { %374 = vmatmul.mubr.f32.gmra.mrb[12].mxu0 %v214_v37  ;;  %414 = vmatmul.mubr.f32.gmra.mrb[12].mxu1 %v222_v38  ;;  %v215_v43 = vsel %vm207_vm0, %v467_v20, %v701_v40  ;;  %v223_v44 = vsel %vm207_vm0, %v475_v21, %v702_v39 }
  0x97   :  { %378 = vmatprep.mubr.f32.mxu0 %v231_v41  ;;  %418 = vmatprep.mubr.f32.mxu1 %v239_v42 }
  0x9a   :  { %379 = vmatmul.mubr.f32.gmra.mrb[14].mxu0 %v215_v43  ;;  %419 = vmatmul.mubr.f32.gmra.mrb[14].mxu1 %v223_v44 }
 0x151   :  { %v526_v45 = vpop.f32.mrb[0].mxu0  ;;  %v550_v46 = vpop.f32.mrb[0].mxu1 }
 0x152   :  { %v527_v48 = vpop.f32.mrb[1].mxu0  ;;  %v551_v49 = vpop.f32.mrb[1].mxu1 }
 0x153   :  { %v528_v50 = vadd.f32 %v527_v48, %v526_v45  ;;  %v552_v51 = vadd.f32 %v551_v49, %v550_v46 }
 0x155   :  { %v346_v52 = vadd.f32 %v528_v50, %v979_v47  ;;  %v386_v53 = vadd.f32 %v552_v51, %v979_v47  ;;  %v529_v54 = vpop.f32.mrb[2].mxu0  ;;  %v553_v55 = vpop.f32.mrb[2].mxu1 }
 0x156   :  { %v530_v56 = vpop.f32.mrb[3].mxu0  ;;  %v554_v57 = vpop.f32.mrb[3].mxu1 }
 0x157   :  { %v424_v58 = vmax.f32 %v346_v52, 0.0  ;;  %v432_v59 = vmax.f32 %v386_v53, 0.0  ;;  %v531_v60 = vadd.f32 %v530_v56, %v529_v54  ;;  %v555_v61 = vadd.f32 %v554_v57, %v553_v55 }
 0x159   :  { %441 = vst.msk [vmem:[%s1064_s3] sm:$0xff] %vm440_vm1, %v424_v58  ;;  %449 = vst.msk [vmem:[%s1064_s3 + $0x40] sm:$0xff] %vm440_vm1, %v432_v59  ;;  %v351_v62 = vadd.f32 %v531_v60, %v979_v47  ;;  %v391_v63 = vadd.f32 %v555_v61, %v979_v47  ;;  %v532_v0 = vpop.f32.mrb[4].mxu0  ;;  %v556_v1 = vpop.f32.mrb[4].mxu1 }
 0x15a   :  { %v533_v2 = vpop.f32.mrb[5].mxu0  ;;  %v557_v3 = vpop.f32.mrb[5].mxu1 }
 0x15b   :  { %v425_v4 = vmax.f32 %v351_v62, 0.0  ;;  %v433_v5 = vmax.f32 %v391_v63, 0.0  ;;  %v534_v6 = vadd.f32 %v533_v2, %v532_v0  ;;  %v558_v7 = vadd.f32 %v557_v3, %v556_v1 }
 0x15d   :  { %442 = vst.msk [vmem:[%s1064_s3 + $0x8] sm:$0xff] %vm440_vm1, %v425_v4  ;;  %450 = vst.msk [vmem:[%s1064_s3 + $0x48] sm:$0xff] %vm440_vm1, %v433_v5  ;;  %v356_v8 = vadd.f32 %v534_v6, %v979_v47  ;;  %v396_v9 = vadd.f32 %v558_v7, %v979_v47  ;;  %v535_v10 = vpop.f32.mrb[6].mxu0  ;;  %v559_v11 = vpop.f32.mrb[6].mxu1 }
 0x15e   :  { %v536_v12 = vpop.f32.mrb[7].mxu0  ;;  %v560_v13 = vpop.f32.mrb[7].mxu1 }
 0x15f   :  { %v426_v14 = vmax.f32 %v356_v8, 0.0  ;;  %v434_v15 = vmax.f32 %v396_v9, 0.0  ;;  %v537_v16 = vadd.f32 %v536_v12, %v535_v10  ;;  %v561_v17 = vadd.f32 %v560_v13, %v559_v11 }
 0x161   :  { %443 = vst.msk [vmem:[%s1064_s3 + $0x10] sm:$0xff] %vm440_vm1, %v426_v14  ;;  %451 = vst.msk [vmem:[%s1064_s3 + $0x50] sm:$0xff] %vm440_vm1, %v434_v15  ;;  %v361_v18 = vadd.f32 %v537_v16, %v979_v47  ;;  %v401_v19 = vadd.f32 %v561_v17, %v979_v47  ;;  %v538_v20 = vpop.f32.mrb[8].mxu0  ;;  %v562_v21 = vpop.f32.mrb[8].mxu1 }
 0x162   :  { %v539_v22 = vpop.f32.mrb[9].mxu0  ;;  %v563_v23 = vpop.f32.mrb[9].mxu1 }
 0x163   :  { %v427_v24 = vmax.f32 %v361_v18, 0.0  ;;  %v435_v25 = vmax.f32 %v401_v19, 0.0  ;;  %v540_v26 = vadd.f32 %v539_v22, %v538_v20  ;;  %v564_v27 = vadd.f32 %v563_v23, %v562_v21 }
 0x165   :  { %444 = vst.msk [vmem:[%s1064_s3 + $0x18] sm:$0xff] %vm440_vm1, %v427_v24  ;;  %452 = vst.msk [vmem:[%s1064_s3 + $0x58] sm:$0xff] %vm440_vm1, %v435_v25  ;;  %v366_v28 = vadd.f32 %v540_v26, %v979_v47  ;;  %v406_v29 = vadd.f32 %v564_v27, %v979_v47  ;;  %v541_v30 = vpop.f32.mrb[10].mxu0  ;;  %v565_v31 = vpop.f32.mrb[10].mxu1 }
 0x166   :  { %v542_v32 = vpop.f32.mrb[11].mxu0  ;;  %v566_v33 = vpop.f32.mrb[11].mxu1 }
 0x167   :  { %v428_v34 = vmax.f32 %v366_v28, 0.0  ;;  %v436_v35 = vmax.f32 %v406_v29, 0.0  ;;  %v543_v36 = vadd.f32 %v542_v32, %v541_v30  ;;  %v567_v37 = vadd.f32 %v566_v33, %v565_v31 }
 0x169   :  { %445 = vst.msk [vmem:[%s1064_s3 + $0x20] sm:$0xff] %vm440_vm1, %v428_v34  ;;  %453 = vst.msk [vmem:[%s1064_s3 + $0x60] sm:$0xff] %vm440_vm1, %v436_v35  ;;  %v371_v38 = vadd.f32 %v543_v36, %v979_v47  ;;  %v411_v39 = vadd.f32 %v567_v37, %v979_v47  ;;  %v544_v40 = vpop.f32.mrb[12].mxu0  ;;  %v568_v41 = vpop.f32.mrb[12].mxu1 }
 0x16a   :  { %v545_v42 = vpop.f32.mrb[13].mxu0  ;;  %v569_v43 = vpop.f32.mrb[13].mxu1 }
 0x16b   :  { %v429_v44 = vmax.f32 %v371_v38, 0.0  ;;  %v437_v45 = vmax.f32 %v411_v39, 0.0  ;;  %v546_v46 = vadd.f32 %v545_v42, %v544_v40  ;;  %v570_v48 = vadd.f32 %v569_v43, %v568_v41 }
 0x16d   :  { %446 = vst.msk [vmem:[%s1064_s3 + $0x28] sm:$0xff] %vm440_vm1, %v429_v44  ;;  %454 = vst.msk [vmem:[%s1064_s3 + $0x68] sm:$0xff] %vm440_vm1, %v437_v45  ;;  %v376_v49 = vadd.f32 %v546_v46, %v979_v47  ;;  %v416_v50 = vadd.f32 %v570_v48, %v979_v47  ;;  %v547_v51 = vpop.f32.mrb[14].mxu0  ;;  %v571_v52 = vpop.f32.mrb[14].mxu1 }
 0x16e   :  { %v548_v53 = vpop.f32.mrb[15].mxu0  ;;  %v572_v54 = vpop.f32.mrb[15].mxu1 }
 0x16f   :  { %v430_v55 = vmax.f32 %v376_v49, 0.0  ;;  %v438_v56 = vmax.f32 %v416_v50, 0.0  ;;  %v549_v57 = vadd.f32 %v548_v53, %v547_v51  ;;  %v573_v58 = vadd.f32 %v572_v54, %v571_v52 }
 0x171   :  { %447 = vst.msk [vmem:[%s1064_s3 + $0x30] sm:$0xff] %vm440_vm1, %v430_v55  ;;  %455 = vst.msk [vmem:[%s1064_s3 + $0x70] sm:$0xff] %vm440_vm1, %v438_v56  ;;  %v381_v59 = vadd.f32 %v549_v57, %v979_v47  ;;  %v421_v60 = vadd.f32 %v573_v58, %v979_v47 }
 0x173   :  { %v431_v61 = vmax.f32 %v381_v59, 0.0  ;;  %v439_v62 = vmax.f32 %v421_v60, 0.0 }
 0x175   :  { %448 = vst.msk [vmem:[%s1064_s3 + $0x38] sm:$0xff] %vm440_vm1, %v431_v61  ;;  %456 = vst.msk [vmem:[%s1064_s3 + $0x78] sm:$0xff] %vm440_vm1, %v439_v62 }

// kernel: dqn_forward.5
= control target key start
LH: loop header
LB: loop body
LE: loop exit
PB: predicated region body
PF: predicated region fallthrough
CT: control target
= control target key end

     0   :  { %v1107_v56 = vmov 1966171168   ;;  %v68_v58 = vlaneseq  ;;  %vm935_vm0 = vcmask 518144   ;;  %s1515_s1 = inlined_call_operand.vmem [shape: f32[512,64], index: 1, kind: input, shape index: {}]   ;;  %s1516_s0 = inlined_call_operand.vmem [shape: f32[2,4,4,128], index: 0, kind: input, shape index: {}]   ;;  %s1517_s2 = inlined_call_operand.vmem [shape: f32[1,64], index: 2, kind: input, shape index: {}]   ;;  %s1518_s3 = inlined_call_operand.vmem [shape: f32[2,3,3,64], index: 3, kind: output, shape index: {}]  }
   0x1   :  { %v277_v0 = vld [vmem:[%s1515_s1 + $0x80] sm:$0xff]  ;;  %v278_v1 = vld [vmem:[%s1515_s1 + $0x88] sm:$0xff]  ;;  %v279_v11 = vld [vmem:[%s1515_s1 + $0x90] sm:$0xff]  ;;  %v66_v57 = vunpack.c.l.s4 %v1107_v56 }
   0x2   :  { %v261_v2 = vld [vmem:[%s1515_s1] sm:$0xff]  ;;  %v1042_v3 = vpack.c.bf16 %v278_v1, %v277_v0  ;;  %v262_v4 = vld [vmem:[%s1515_s1 + $0x8] sm:$0xff]  ;;  %v280_v13 = vld [vmem:[%s1515_s1 + $0x98] sm:$0xff] }
   0x3   :  { %v309_v5 = vld [vmem:[%s1515_s1 + $0x180] sm:$0xff]  ;;  %v310_v6 = vld [vmem:[%s1515_s1 + $0x188] sm:$0xff]  ;;  %v1044_v7 = vpack.c.bf16 %v262_v4, %v261_v2  ;;  %v263_v14 = vld [vmem:[%s1515_s1 + $0x10] sm:$0xff]  ;;  %v1046_v16 = vpack.c.bf16 %v280_v13, %v279_v11 }
   0x4   :  { %v1074_v8 = vpack.c.bf16 %v310_v6, %v309_v5  ;;  %v293_v9 = vld [vmem:[%s1515_s1 + $0x100] sm:$0xff]  ;;  %v294_v10 = vld [vmem:[%s1515_s1 + $0x108] sm:$0xff]  ;;  %1043 = vmatprep.subr.bf16.mxu0 %v1042_v3  ;;  %v264_v15 = vld [vmem:[%s1515_s1 + $0x18] sm:$0xff] }
   0x5   :  { %v1076_v12 = vpack.c.bf16 %v294_v10, %v293_v9  ;;  %1045 = vmatpush3.bf16.msra.mxu0 %v1044_v7  ;;  %v1048_v17 = vpack.c.bf16 %v264_v15, %v263_v14  ;;  %v311_v18 = vld [vmem:[%s1515_s1 + $0x190] sm:$0xff]  ;;  %v312_v19 = vld [vmem:[%s1515_s1 + $0x198] sm:$0xff]  ;;  %v281_v23 = vld [vmem:[%s1515_s1 + $0xa0] sm:$0xff]  ;;  %v67_v7 = vunpack.c.0.s8 %v66_v57 }
   0x6   :  { %1075 = vmatprep.subr.bf16.mxu1 %v1074_v8  ;;  %v295_v20 = vld [vmem:[%s1515_s1 + $0x110] sm:$0xff]  ;;  %v1078_v21 = vpack.c.bf16 %v312_v19, %v311_v18  ;;  %v296_v22 = vld [vmem:[%s1515_s1 + $0x118] sm:$0xff]  ;;  %v282_v24 = vld [vmem:[%s1515_s1 + $0xa8] sm:$0xff]  ;;  %1047 = vmatprep.subr.bf16.mxu0 %v1046_v16  ;;  %v69_v8 = vshrl.u32 %v68_v58, 7 }
   0x7   :  { %1077 = vmatpush3.bf16.msra.mxu1 %v1076_v12  ;;  %v1080_v25 = vpack.c.bf16 %v296_v22, %v295_v20  ;;  %v1050_v26 = vpack.c.bf16 %v282_v24, %v281_v23  ;;  %v265_v27 = vld [vmem:[%s1515_s1 + $0x20] sm:$0xff]  ;;  %v266_v28 = vld [vmem:[%s1515_s1 + $0x28] sm:$0xff]  ;;  %v283_v35 = vld [vmem:[%s1515_s1 + $0xb0] sm:$0xff] }
   0x8   :  { %v313_v29 = vld [vmem:[%s1515_s1 + $0x1a0] sm:$0xff]  ;;  %1079 = vmatprep.subr.bf16.mxu1 %v1078_v21  ;;  %v314_v30 = vld [vmem:[%s1515_s1 + $0x1a8] sm:$0xff]  ;;  %v1052_v33 = vpack.c.bf16 %v266_v28, %v265_v27  ;;  %v284_v36 = vld [vmem:[%s1515_s1 + $0xb8] sm:$0xff]  ;;  %v1318_v28 = vsub.s32 %v67_v7, %v69_v8 }
   0x9   :  { %v297_v31 = vld [vmem:[%s1515_s1 + $0x120] sm:$0xff]  ;;  %v298_v32 = vld [vmem:[%s1515_s1 + $0x128] sm:$0xff]  ;;  %1049 = vmatpush3.bf16.msra.mxu0 %v1048_v17  ;;  %v1082_v34 = vpack.c.bf16 %v314_v30, %v313_v29  ;;  %v267_v37 = vld [vmem:[%s1515_s1 + $0x30] sm:$0xff]  ;;  %v1054_v39 = vpack.c.bf16 %v284_v36, %v283_v35 }
   0xa   :  { %1051 = vmatprep.subr.bf16.mxu0 %v1050_v26  ;;  %v1084_v38 = vpack.c.bf16 %v298_v32, %v297_v31  ;;  %v268_v40 = vld [vmem:[%s1515_s1 + $0x38] sm:$0xff]  ;;  %v315_v41 = vld [vmem:[%s1515_s1 + $0x1b0] sm:$0xff]  ;;  %v285_v46 = vld [vmem:[%s1515_s1 + $0xc0] sm:$0xff] }
   0xb   :  { %1081 = vmatpush3.bf16.msra.mxu1 %v1080_v25  ;;  %v316_v42 = vld [vmem:[%s1515_s1 + $0x1b8] sm:$0xff]  ;;  %v299_v44 = vld [vmem:[%s1515_s1 + $0x130] sm:$0xff]  ;;  %v286_v47 = vld [vmem:[%s1515_s1 + $0xc8] sm:$0xff]  ;;  %v1056_v48 = vpack.c.bf16 %v268_v40, %v267_v37 }
   0xc   :  { %1083 = vmatprep.subr.bf16.mxu1 %v1082_v34  ;;  %v1086_v43 = vpack.c.bf16 %v316_v42, %v315_v41  ;;  %v300_v45 = vld [vmem:[%s1515_s1 + $0x138] sm:$0xff]  ;;  %v317_v49 = vld [vmem:[%s1515_s1 + $0x1c0] sm:$0xff]  ;;  %v318_v50 = vld [vmem:[%s1515_s1 + $0x1c8] sm:$0xff]  ;;  %v1058_v52 = vpack.c.bf16 %v286_v47, %v285_v46 }
   0xd   :  { %1053 = vmatpush3.bf16.msra.mxu0 %v1052_v33  ;;  %v1088_v51 = vpack.c.bf16 %v300_v45, %v299_v44  ;;  %v269_v53 = vld [vmem:[%s1515_s1 + $0x40] sm:$0xff]  ;;  %v270_v54 = vld [vmem:[%s1515_s1 + $0x48] sm:$0xff]  ;;  %v1090_v59 = vpack.c.bf16 %v318_v50, %v317_v49  ;;  %v287_v61 = vld [vmem:[%s1515_s1 + $0xd0] sm:$0xff] }
   0xe   :  { %1055 = vmatprep.subr.bf16.mxu0 %v1054_v39  ;;  %v301_v55 = vld [vmem:[%s1515_s1 + $0x140] sm:$0xff]  ;;  %v302_v60 = vld [vmem:[%s1515_s1 + $0x148] sm:$0xff]  ;;  %v288_v62 = vld [vmem:[%s1515_s1 + $0xd8] sm:$0xff]  ;;  %v1060_v1 = vpack.c.bf16 %v270_v54, %v269_v53 }
   0xf   :  { %1085 = vmatpush3.bf16.msra.mxu1 %v1084_v38  ;;  %v319_v63 = vld [vmem:[%s1515_s1 + $0x1d0] sm:$0xff]  ;;  %v320_v0 = vld [vmem:[%s1515_s1 + $0x1d8] sm:$0xff]  ;;  %v1092_v2 = vpack.c.bf16 %v302_v60, %v301_v55  ;;  %v1062_v3 = vpack.c.bf16 %v288_v62, %v287_v61  ;;  %v289_v11 = vld [vmem:[%s1515_s1 + $0xe0] sm:$0xff] }
  0x10   :  { %1087 = vmatprep.subr.bf16.mxu1 %v1086_v43  ;;  %v271_v4 = vld [vmem:[%s1515_s1 + $0x50] sm:$0xff]  ;;  %v272_v5 = vld [vmem:[%s1515_s1 + $0x58] sm:$0xff]  ;;  %v1094_v9 = vpack.c.bf16 %v320_v0, %v319_v63  ;;  %v290_v12 = vld [vmem:[%s1515_s1 + $0xe8] sm:$0xff] }
  0x11   :  { %1057 = vmatpush3.bf16.msra.mxu0 %v1056_v48  ;;  %v303_v6 = vld [vmem:[%s1515_s1 + $0x150] sm:$0xff]  ;;  %v304_v10 = vld [vmem:[%s1515_s1 + $0x158] sm:$0xff]  ;;  %v1281_v13 = vld [vmem:[%s1515_s1 + $0x60] sm:$0xff]  ;;  %v1064_v18 = vpack.c.bf16 %v272_v5, %v271_v4  ;;  %v1066_v23 = vpack.c.bf16 %v290_v12, %v289_v11 }
  0x12   :  { %1059 = vmatprep.subr.bf16.mxu0 %v1058_v52  ;;  %v274_v14 = vld [vmem:[%s1515_s1 + $0x68] sm:$0xff]  ;;  %v321_v15 = vld [vmem:[%s1515_s1 + $0x1e0] sm:$0xff]  ;;  %v291_v20 = vld [vmem:[%s1515_s1 + $0xf0] sm:$0xff]  ;;  %v1096_v22 = vpack.c.bf16 %v304_v10, %v303_v6 }
  0x13   :  { %1089 = vmatpush3.bf16.msra.mxu1 %v1088_v51  ;;  %v322_v16 = vld [vmem:[%s1515_s1 + $0x1e8] sm:$0xff]  ;;  %v1295_v17 = vld [vmem:[%s1515_s1 + $0x160] sm:$0xff]  ;;  %v292_v21 = vld [vmem:[%s1515_s1 + $0xf8] sm:$0xff]  ;;  %v1068_v42 = vpack.c.bf16 %v274_v14, %v1281_v13 }
  0x14   :  { %1091 = vmatprep.subr.bf16.mxu1 %v1090_v59  ;;  %v306_v19 = vld [vmem:[%s1515_s1 + $0x168] sm:$0xff]  ;;  %v323_v24 = vld [vmem:[%s1515_s1 + $0x1f0] sm:$0xff]  ;;  %v324_v25 = vld [vmem:[%s1515_s1 + $0x1f8] sm:$0xff]  ;;  %v1098_v29 = vpack.c.bf16 %v322_v16, %v321_v15  ;;  %v1070_v44 = vpack.c.bf16 %v292_v21, %v291_v20 }
  0x15   :  { %1061 = vmatpush3.bf16.msra.mxu0 %v1060_v1  ;;  %v14_v26 = vld [vmem:[%s1516_s0] sm:$0x7]  ;;  %v15_v27 = vld [vmem:[%s1516_s0 + $0x4] sm:$0x7]  ;;  %v1323_v30 = vld [vmem:[%s1515_s1 + $0x70] sm:$0xff]  ;;  %v1100_v43 = vpack.c.bf16 %v306_v19, %v1295_v17  ;;  %v1102_v55 = vpack.c.bf16 %v324_v25, %v323_v24 }
  0x16   :  { %1063 = vmatprep.subr.bf16.mxu0 %v1062_v3  ;;  %v1328_v31 = vld [vmem:[%s1515_s1 + $0x78] sm:$0xff]  ;;  %v16_v32 = vld [vmem:[%s1516_s0 + $0x8] sm:$0x7]  ;;  %v20_v33 = vld [vmem:[%s1516_s0 + $0x1] sm:$0x7] }
  0x17   :  { %1093 = vmatpush3.bf16.msra.mxu1 %v1092_v2  ;;  %v21_v34 = vld [vmem:[%s1516_s0 + $0x5] sm:$0x7]  ;;  %v1342_v35 = vld [vmem:[%s1515_s1 + $0x170] sm:$0xff]  ;;  %v1347_v36 = vld [vmem:[%s1515_s1 + $0x178] sm:$0xff]  ;;  %v63_v40 = vcombine.low %v14_v26, %v20_v33  ;;  %v1072_v62 = vpack.c.bf16 %v1328_v31, %v1323_v30 }
  0x18   :  { %1095 = vmatprep.subr.bf16.mxu1 %v1094_v9  ;;  %v22_v37 = vld [vmem:[%s1516_s0 + $0x9] sm:$0x7]  ;;  %v946_v38 = vld [vmem:[%s1516_s0 + $0x4] sm:$0x7]  ;;  %v96_v41 = vcombine.low %v15_v27, %v21_v34  ;;  %v948_v45 = vld [vmem:[%s1516_s0 + $0xc] sm:$0x7]  ;;  %v1104_v4 = vpack.c.bf16 %v1347_v36, %v1342_v35 }
  0x19   :  { %v947_v39 = vld [vmem:[%s1516_s0 + $0x8] sm:$0x7]  ;;  %1065 = vmatpush3.bf16.msra.mxu0 %v1064_v18  ;;  %v952_v46 = vld [vmem:[%s1516_s0 + $0x5] sm:$0x7]  ;;  %v129_v48 = vcombine.low %v16_v32, %v22_v37  ;;  %v954_v49 = vld [vmem:[%s1516_s0 + $0xd] sm:$0x7]  ;;  %v71_v51 = vrot.slane %v63_v40, %v1318_v28 }
  0x1a   :  { %v953_v47 = vld [vmem:[%s1516_s0 + $0x9] sm:$0x7]  ;;  %1067 = vmatprep.subr.bf16.mxu0 %v1066_v23  ;;  %v64_v50 = vcombine.low %v946_v38, %v952_v46  ;;  %v17_v53 = vld [vmem:[%s1516_s0 + $0x10] sm:$0x7]  ;;  %v18_v54 = vld [vmem:[%s1516_s0 + $0x14] sm:$0x7]  ;;  %v104_v56 = vrot.slane %v96_v41, %v1318_v28  ;;  %v130_v57 = vcombine.low %v948_v45, %v954_v49 }
  0x1b   :  { %1097 = vmatpush3.bf16.msra.mxu1 %v1096_v22  ;;  %v97_v52 = vcombine.low %v947_v39, %v953_v47  ;;  %v137_v58 = vrot.slane %v129_v48, %v1318_v28  ;;  %v19_v59 = vld [vmem:[%s1516_s0 + $0x18] sm:$0x7]  ;;  %v23_v60 = vld [vmem:[%s1516_s0 + $0x11] sm:$0x7]  ;;  %v24_v61 = vld [vmem:[%s1516_s0 + $0x15] sm:$0x7] }
  0x1c   :  { %1099 = vmatprep.subr.bf16.mxu1 %v1098_v29  ;;  %v78_v63 = vrot.slane %v64_v50, %v1318_v28  ;;  %v25_v1 = vld [vmem:[%s1516_s0 + $0x19] sm:$0x7]  ;;  %v949_v2 = vld [vmem:[%s1516_s0 + $0x14] sm:$0x7]  ;;  %v162_v3 = vcombine.low %v17_v53, %v23_v60  ;;  %v144_v5 = vrot.slane %v130_v57, %v1318_v28  ;;  %v195_v7 = vcombine.low %v18_v54, %v24_v61  ;;  %v951_v33 = vld [vmem:[%s1516_s0 + $0x1c] sm:$0x7] }
  0x1d   :  { %v111_v0 = vrot.slane %v97_v52, %v1318_v28  ;;  %1069 = vmatpush3.bf16.msra.mxu0 %v1068_v42  ;;  %v955_v6 = vld [vmem:[%s1516_s0 + $0x15] sm:$0x7]  ;;  %v228_v8 = vcombine.low %v19_v59, %v25_v1  ;;  %v950_v15 = vld [vmem:[%s1516_s0 + $0x18] sm:$0x7]  ;;  %v957_v34 = vld [vmem:[%s1516_s0 + $0x1d] sm:$0x7] }
  0x1e   :  { %1071 = vmatprep.subr.bf16.mxu0 %v1070_v44  ;;  %v79_v9 = vcombine.low %v71_v51, %v78_v63  ;;  %v80_v10 = vcombine.high %v71_v51, %v78_v63  ;;  %v145_v13 = vcombine.low %v137_v58, %v144_v5  ;;  %v146_v14 = vcombine.high %v137_v58, %v144_v5  ;;  %v956_v16 = vld [vmem:[%s1516_s0 + $0x19] sm:$0x7] }
  0x1f   :  { %1101 = vmatpush3.bf16.msra.mxu1 %v1100_v43  ;;  %v112_v11 = vcombine.low %v104_v56, %v111_v0  ;;  %v113_v12 = vcombine.high %v104_v56, %v111_v0  ;;  %v163_v17 = vcombine.low %v949_v2, %v955_v6  ;;  %v170_v21 = vrot.slane %v162_v3, %v1318_v28 }
  0x20   :  { %1103 = vmatprep.subr.bf16.mxu1 %v1102_v55  ;;  %v87_v18 = vrot.slane %v79_v9, %v1318_v28  ;;  %v94_v19 = vrot.slane %v80_v10, %v1318_v28  ;;  %v153_v23 = vrot.slane %v145_v13, %v1318_v28  ;;  %v160_v24 = vrot.slane %v146_v14, %v1318_v28 }
  0x21   :  { %v120_v20 = vrot.slane %v112_v11, %v1318_v28  ;;  %1073 = vmatpush3.bf16.msra.mxu0 %v1072_v62  ;;  %v127_v22 = vrot.slane %v113_v12, %v1318_v28  ;;  %v177_v25 = vrot.slane %v163_v17, %v1318_v28  ;;  %v196_v30 = vcombine.low %v950_v15, %v956_v16 }
  0x22   :  { %v95_v26 = vcombine.high %v87_v18, %v87_v18  ;;  %v332_v29 = vcombine.low %v87_v18, %v94_v19  ;;  %v161_v31 = vcombine.high %v153_v23, %v153_v23  ;;  %v335_v32 = vcombine.low %v153_v23, %v160_v24 }
  0x23   :  { %1105 = vmatpush3.bf16.msra.mxu1 %v1104_v4  ;;  %v128_v27 = vcombine.high %v120_v20, %v120_v20  ;;  %v178_v35 = vcombine.low %v170_v21, %v177_v25  ;;  %v179_v36 = vcombine.high %v170_v21, %v177_v25  ;;  %v203_v40 = vrot.slane %v195_v7, %v1318_v28 }
  0x24   :  { %v333_v37 = vcombine.low %v95_v26, %v120_v20  ;;  %v342_v39 = vrot.slane %v332_v29, %v1318_v28  ;;  %v363_v41 = vrot.slane %v335_v32, %v1318_v28  ;;  %v210_v44 = vrot.slane %v196_v30, %v1318_v28 }
  0x25   :  { %v334_v38 = vcombine.low %v127_v22, %v128_v27  ;;  %v186_v42 = vrot.slane %v178_v35, %v1318_v28  ;;  %v193_v43 = vrot.slane %v179_v36, %v1318_v28  ;;  %v229_v47 = vcombine.low %v951_v33, %v957_v34 }
  0x26   :  { %v349_v45 = vrot.slane %v333_v37, %v1318_v28  ;;  %v236_v48 = vrot.slane %v228_v8, %v1318_v28  ;;  %v211_v50 = vcombine.low %v203_v40, %v210_v44  ;;  %v212_v51 = vcombine.high %v203_v40, %v210_v44 }
  0x27   :  { %v356_v46 = vrot.slane %v334_v38, %v1318_v28  ;;  %v194_v49 = vcombine.high %v186_v42, %v186_v42  ;;  %v400_v52 = vcombine.low %v161_v31, %v186_v42  ;;  %v243_v59 = vrot.slane %v229_v47, %v1318_v28 }
  0x28   :  { %v365_v53 = vcombine.high %v342_v39, %v349_v45  ;;  %v364_v55 = vcombine.low %v342_v39, %v349_v45  ;;  %v219_v57 = vrot.slane %v211_v50, %v1318_v28  ;;  %v226_v58 = vrot.slane %v212_v51, %v1318_v28  ;;  %v958_v39 = vld [vmem:[%s1517_s2] ss:$0 sm:$0xff] }
  0x29   :  { %v367_v54 = vcombine.high %v356_v46, %v363_v41  ;;  %v366_v56 = vcombine.low %v356_v46, %v363_v41  ;;  %v401_v60 = vcombine.low %v193_v43, %v194_v49  ;;  %v244_v2 = vcombine.low %v236_v48, %v243_v59 }
  0x2a   :  { %v381_v61 = vrot.slane %v365_v53, %v1318_v28  ;;  %v374_v63 = vrot.slane %v364_v55, %v1318_v28  ;;  %v227_v1 = vcombine.high %v219_v57, %v219_v57  ;;  %v402_v3 = vcombine.low %v219_v57, %v226_v58 }
  0x2b   :  { %v395_v62 = vrot.slane %v367_v54, %v1318_v28  ;;  %v388_v0 = vrot.slane %v366_v56, %v1318_v28  ;;  %v410_v4 = vrot.slane %v400_v52, %v1318_v28  ;;  %v252_v9 = vrot.slane %v244_v2, %v1318_v28 }
  0x2c   :  { %v417_v10 = vrot.slane %v401_v60, %v1318_v28  ;;  %v245_v11 = vcombine.high %v236_v48, %v243_v59  ;;  %v424_v12 = vrot.slane %v402_v3, %v1318_v28 }
  0x2d   :  { %v398_v5 = vcombine.low %v381_v61, %v395_v62  ;;  %v396_v6 = vcombine.low %v374_v63, %v388_v0  ;;  %v399_v7 = vcombine.high %v381_v61, %v395_v62  ;;  %v397_v8 = vcombine.high %v374_v63, %v388_v0 }
  0x2e   :  { %v403_v13 = vcombine.low %v227_v1, %v252_v9  ;;  %v433_v14 = vcombine.high %v410_v4, %v417_v10  ;;  %v432_v15 = vcombine.low %v410_v4, %v417_v10  ;;  %v259_v16 = vrot.slane %v245_v11, %v1318_v28 }
  0x2f   :  { %569 = vmatprep.mubr.f32.mxu0 %v398_v5  ;;  %649 = vmatprep.mubr.f32.mxu1 %v399_v7  ;;  %v260_v17 = vcombine.high %v252_v9, %v252_v9 }
  0x30   :  { %570 = vmatmul.mubr.f32.vlgmr.msra.gmra.mrb[0].mxu0 %v396_v6  ;;  %650 = vmatmul.mubr.f32.vlgmr.msra.gmra.mrb[0].mxu1 %v397_v8  ;;  %v431_v18 = vrot.slane %v403_v13, %v1318_v28  ;;  %v449_v21 = vrot.slane %v433_v14, %v1318_v28  ;;  %v442_v23 = vrot.slane %v432_v15, %v1318_v28 }
  0x31   :  { %v468_v19 = vcombine.low %v259_v16, %v260_v17 }
  0x32   :  { %v435_v20 = vcombine.high %v424_v12, %v431_v18  ;;  %v434_v22 = vcombine.low %v424_v12, %v431_v18 }
  0x33   :  { %v475_v24 = vrot.slane %v468_v19, %v1318_v28 }
  0x34   :  { %v463_v25 = vrot.slane %v435_v20, %v1318_v28  ;;  %v456_v26 = vrot.slane %v434_v22, %v1318_v28 }
  0x35   :  { %v476_v27 = vcombine.high %v475_v24, %v475_v24  ;;  %v483_v29 = vrot.slane %v475_v24, %v1318_v28 }
  0x36   :  { %v466_v30 = vcombine.low %v449_v21, %v463_v25  ;;  %v464_v31 = vcombine.low %v442_v23, %v456_v26  ;;  %v467_v32 = vcombine.high %v449_v21, %v463_v25  ;;  %v465_v33 = vcombine.high %v442_v23, %v456_v26 }
  0x37   :  { %v490_v34 = vrot.slane %v476_v27, %v1318_v28  ;;  %v491_v36 = vcombine.high %v483_v29, %v483_v29 }
  0x38   :  { %574 = vmatprep.mubr.f32.mxu0 %v466_v30  ;;  %654 = vmatprep.mubr.f32.mxu1 %v467_v32 }
  0x39   :  { %575 = vmatmul.mubr.f32.gmra.mrb[2].mxu0 %v464_v31  ;;  %655 = vmatmul.mubr.f32.gmra.mrb[2].mxu1 %v465_v33  ;;  %v492_v35 = vcombine.high %v490_v34, %v490_v34 }
  0x3a   :  { %579 = vmatprep.mubr.f32.mxu0 %v490_v34 }
  0x3b   :  { %659 = vmatprep.mubr.f32.mxu1 %v492_v35 }
  0x3d   :  { %580 = vmatmul.mubr.f32.gmra.mrb[4].mxu0 %v483_v29  ;;  %660 = vmatmul.mubr.f32.gmra.mrb[4].mxu1 %v491_v36 }
 0x103   :  { %v992_v37 = vpop.f32.mrb[0].mxu0  ;;  %v1033_v38 = vpop.f32.mrb[0].mxu1 }
 0x104   :  { %v993_v40 = vpop.f32.mrb[1].mxu0  ;;  %v1034_v41 = vpop.f32.mrb[1].mxu1 }
 0x105   :  { %v994_v42 = vadd.f32 %v993_v40, %v992_v37  ;;  %v1035_v43 = vadd.f32 %v1034_v41, %v1033_v38 }
 0x107   :  { %v572_v44 = vadd.f32 %v994_v42, %v958_v39 }
 0x109   :  { %v652_v45 = vadd.f32 %v1035_v43, %v572_v44 }
 0x10b   :  { %v665_v46 = vmax.f32 %v652_v45, 0.0 }
 0x10c   :  { %v995_v49 = vpop.f32.mrb[2].mxu0  ;;  %v1036_v50 = vpop.f32.mrb[2].mxu1 }
 0x10d   :  { %v671_v47 = vcombine.high %v665_v46, %v665_v46  ;;  %v678_v48 = vrot.slane %v665_v46, %v1318_v28  ;;  %v996_v54 = vpop.f32.mrb[3].mxu0  ;;  %v1037_v55 = vpop.f32.mrb[3].mxu1 }
 0x10e   :  { %v997_v56 = vadd.f32 %v996_v54, %v995_v49  ;;  %v1038_v57 = vadd.f32 %v1037_v55, %v1036_v50 }
 0x10f   :  { %v685_v51 = vrot.slane %v671_v47, %v1318_v28  ;;  %v686_v52 = vcombine.high %v678_v48, %v678_v48  ;;  %v694_v53 = vrot.slane %v678_v48, %v1318_v28 }
 0x110   :  { %v577_v61 = vadd.f32 %v997_v56, %v958_v39  ;;  %v998_v62 = vpop.f32.mrb[4].mxu0  ;;  %v1039_v63 = vpop.f32.mrb[4].mxu1 }
 0x111   :  { %v687_v58 = vcombine.high %v685_v51, %v685_v51  ;;  %v708_v59 = vrot.slane %v686_v52, %v1318_v28  ;;  %v716_v60 = vcombine.high %v694_v53, %v694_v53  ;;  %v701_v0 = vrot.slane %v685_v51, %v1318_v28  ;;  %v999_v4 = vpop.f32.mrb[5].mxu0  ;;  %v1040_v5 = vpop.f32.mrb[5].mxu1 }
 0x112   :  { %v657_v6 = vadd.f32 %v1038_v57, %v577_v61  ;;  %v1000_v7 = vadd.f32 %v999_v4, %v998_v62  ;;  %v1041_v8 = vadd.f32 %v1040_v5, %v1039_v63 }
 0x113   :  { %v715_v1 = vrot.slane %v687_v58, %v1318_v28  ;;  %v718_v2 = vcombine.high %v708_v59, %v708_v59  ;;  %v791_v3 = vcombine.low %v694_v53, %v708_v59  ;;  %v805_v10 = vrot.slane %v716_v60, %v1318_v28 }
 0x114   :  { %v666_v12 = vmax.f32 %v657_v6, 0.0  ;;  %v582_v13 = vadd.f32 %v1000_v7, %v958_v39 }
 0x115   :  { %v798_v9 = vrot.slane %v791_v3, %v1318_v28  ;;  %v814_v11 = vcombine.low %v718_v2, %v701_v0  ;;  %v828_v16 = vrot.slane %v715_v1, %v1318_v28  ;;  %v959_v17 = vcombine.high %v701_v0, %v715_v1 }
 0x116   :  { %v720_v18 = vcombine.high %v666_v12, %v666_v12  ;;  %v727_v19 = vrot.slane %v666_v12, %v1318_v28  ;;  %v662_v20 = vadd.f32 %v1041_v8, %v582_v13 }
 0x117   :  { %v806_v14 = vcombine.low %v798_v9, %v805_v10  ;;  %v821_v15 = vrot.slane %v814_v11, %v1318_v28  ;;  %v844_v29 = vrot.slane %v959_v17, %v1318_v28 }
 0x118   :  { %v734_v23 = vrot.slane %v720_v18, %v1318_v28  ;;  %v735_v24 = vcombine.high %v727_v19, %v727_v19  ;;  %v743_v25 = vrot.slane %v727_v19, %v1318_v28  ;;  %v667_v26 = vmax.f32 %v662_v20, 0.0 }
 0x119   :  { %v813_v21 = vrot.slane %v806_v14, %v1318_v28  ;;  %v829_v22 = vcombine.low %v821_v15, %v828_v16 }
 0x11a   :  { %v736_v30 = vcombine.high %v734_v23, %v734_v23  ;;  %v750_v31 = vrot.slane %v734_v23, %v1318_v28  ;;  %v757_v32 = vrot.slane %v735_v24, %v1318_v28  ;;  %v765_v33 = vcombine.high %v743_v25, %v743_v25 }
 0x11b   :  { %v836_v27 = vrot.slane %v829_v22, %v1318_v28  ;;  %936 = vst.msk [vmem:[%s1518_s3] sm:$0x7] %vm935_vm0, %v813_v21  ;;  %v851_v34 = vrot.slane %v743_v25, %v1318_v28  ;;  %v775_v35 = vrot.slane %v667_v26, %v1318_v28 }
 0x11c   :  { %v764_v36 = vrot.slane %v736_v30, %v1318_v28  ;;  %v766_v37 = vcombine.high %v750_v31, %v750_v31  ;;  %v767_v38 = vcombine.high %v757_v32, %v757_v32  ;;  %v860_v39 = vcombine.low %v757_v32, %v765_v33 }
 0x11d   :  { %937 = vst.msk [vmem:[%s1518_s3 + $0x4] sm:$0x7] %vm935_vm0, %v836_v27  ;;  %v852_v40 = vcombine.low %v844_v29, %v851_v34  ;;  %v776_v41 = vcombine.high %v775_v35, %v775_v35  ;;  %v783_v42 = vrot.slane %v775_v35, %v1318_v28 }
 0x11e   :  { %v867_v43 = vrot.slane %v860_v39, %v1318_v28  ;;  %v874_v44 = vrot.slane %v767_v38, %v1318_v28  ;;  %v883_v45 = vcombine.low %v750_v31, %v764_v36  ;;  %v768_v47 = vcombine.high %v764_v36, %v764_v36 }
 0x11f   :  { %v859_v46 = vrot.slane %v852_v40, %v1318_v28  ;;  %v790_v48 = vrot.slane %v776_v41, %v1318_v28  ;;  %v897_v51 = vrot.slane %v766_v37, %v1318_v28 }
 0x120   :  { %v875_v49 = vcombine.low %v867_v43, %v874_v44  ;;  %v890_v50 = vrot.slane %v883_v45, %v1318_v28  ;;  %v906_v52 = vcombine.low %v768_v47, %v783_v42 }
 0x121   :  { %938 = vst.msk [vmem:[%s1518_s3 + $0x8] sm:$0x7] %vm935_vm0, %v859_v46  ;;  %v920_v53 = vrot.slane %v790_v48, %v1318_v28 }
 0x122   :  { %v882_v54 = vrot.slane %v875_v49, %v1318_v28  ;;  %v898_v55 = vcombine.low %v890_v50, %v897_v51  ;;  %v913_v56 = vrot.slane %v906_v52, %v1318_v28 }
 0x124   :  { %v905_v57 = vrot.slane %v898_v55, %v1318_v28  ;;  %939 = vst.msk [vmem:[%s1518_s3 + $0xc] sm:$0x7] %vm935_vm0, %v882_v54  ;;  %v921_v58 = vcombine.low %v913_v56, %v920_v53 }
 0x126   :  { %940 = vst.msk [vmem:[%s1518_s3 + $0x10] sm:$0x7] %vm935_vm0, %v905_v57  ;;  %v928_v59 = vrot.slane %v921_v58, %v1318_v28 }
 0x128   :  { %941 = vst.msk [vmem:[%s1518_s3 + $0x14] sm:$0x7] %vm935_vm0, %v928_v59 }

// kernel: dqn_forward.6
= control target key start
LH: loop header
LB: loop body
LE: loop exit
PB: predicated region body
PF: predicated region fallthrough
CT: control target
= control target key end

     0   :  { %s637_s30 = smov 64   ;;  %vm66_vm0 = vcmask 523264   ;;  %vm165_vm1 = vcmask 1041409   ;;  %vm639_vm2 = vmmov 0   ;;  %vm417_vm3 = vcmask 516096   ;;  %s959_s0 = inlined_call_operand.vmem [shape: f32[2,3,3,64], index: 0, kind: input, shape index: {}]   ;;  %s960_s1 = inlined_call_operand.vmem [shape: f32[576,64], index: 1, kind: input, shape index: {}]   ;;  %s961_s2 = inlined_call_operand.vmem [shape: f32[1,64], index: 2, kind: input, shape index: {}]   ;;  %s962_s3 = inlined_call_operand.vmem [shape: f32[2,1,1,64], index: 3, kind: output, shape index: {}]  }
   0x1   :  { %v17_v0 = vld [vmem:[%s959_s0 + $0xd] sm:$0x1]  ;;  %v425_v1 = vld [vmem:[%s959_s0 + $0x10] sm:$0x1]  ;;  %v429_v2 = vld [vmem:[%s959_s0 + $0x12] sm:$0x1] }
   0x2   :  { %v617_v3 = vpack.i.bf16 %v17_v0, %v425_v1  ;;  %v433_v4 = vld [vmem:[%s959_s0 + $0x15] sm:$0x1]  ;;  %v16_v5 = vld [vmem:[%s959_s0 + $0x1] sm:$0x1]  ;;  %v424_v6 = vld [vmem:[%s959_s0 + $0x4] sm:$0x1] }
   0x3   :  { %v627_v7 = vpack.i.bf16 %v429_v2, %v433_v4  ;;  %v428_v8 = vld [vmem:[%s959_s0 + $0x6] sm:$0x1]  ;;  %v432_v9 = vld [vmem:[%s959_s0 + $0x9] sm:$0x1]  ;;  %v622_v11 = vpack.i.bf16 %v16_v5, %v424_v6  ;;  %v93_v20 = vld [vmem:[%s960_s1 + $0x90] sm:$0xff] }
   0x4   :  { %v91_v10 = vld [vmem:[%s960_s1 + $0x80] sm:$0xff]  ;;  %618 = vrot.lane.b32.xlu0 %v617_v3, %s637_s30  ;;  %v92_v12 = vld [vmem:[%s960_s1 + $0x88] sm:$0xff]  ;;  %v632_v15 = vpack.i.bf16 %v428_v8, %v432_v9  ;;  %v94_v22 = vld [vmem:[%s960_s1 + $0x98] sm:$0xff] }
   0x5   :  { %v75_v13 = vld [vmem:[%s960_s1] sm:$0xff]  ;;  %v76_v14 = vld [vmem:[%s960_s1 + $0x8] sm:$0xff]  ;;  %628 = vrot.lane.b32.xlu1 %v627_v7, %s637_s30  ;;  %v536_v16 = vpack.c.bf16 %v92_v12, %v91_v10  ;;  %v540_v25 = vpack.c.bf16 %v94_v22, %v93_v20  ;;  %v77_v27 = vld [vmem:[%s960_s1 + $0x10] sm:$0xff] }
   0x6   :  { %v538_v17 = vpack.c.bf16 %v76_v14, %v75_v13  ;;  %v123_v18 = vld [vmem:[%s960_s1 + $0x180] sm:$0xff]  ;;  %v124_v19 = vld [vmem:[%s960_s1 + $0x188] sm:$0xff]  ;;  %v78_v28 = vld [vmem:[%s960_s1 + $0x18] sm:$0xff] }
   0x7   :  { %v568_v21 = vpack.c.bf16 %v124_v19, %v123_v18  ;;  %v107_v23 = vld [vmem:[%s960_s1 + $0x100] sm:$0xff]  ;;  %v108_v24 = vld [vmem:[%s960_s1 + $0x108] sm:$0xff]  ;;  %537 = vmatprep.subr.bf16.mxu0 %v536_v16  ;;  %v125_v29 = vld [vmem:[%s960_s1 + $0x190] sm:$0xff]  ;;  %v542_v30 = vpack.c.bf16 %v78_v28, %v77_v27 }
   0x8   :  { %v570_v26 = vpack.c.bf16 %v108_v24, %v107_v23  ;;  %623 = vrot.lane.b32.xlu0 %v622_v11, %s637_s30  ;;  %539 = vmatpush3.bf16.msra.mxu0 %v538_v17  ;;  %v126_v31 = vld [vmem:[%s960_s1 + $0x198] sm:$0xff]  ;;  %v95_v32 = vld [vmem:[%s960_s1 + $0xa0] sm:$0xff]  ;;  %v96_v33 = vld [vmem:[%s960_s1 + $0xa8] sm:$0xff] }
   0x9   :  { %633 = vrot.lane.b32.xlu1 %v632_v15, %s637_s30  ;;  %569 = vmatprep.subr.bf16.mxu1 %v568_v21  ;;  %v572_v34 = vpack.c.bf16 %v126_v31, %v125_v29  ;;  %v544_v35 = vpack.c.bf16 %v96_v33, %v95_v32  ;;  %v109_v36 = vld [vmem:[%s960_s1 + $0x110] sm:$0xff]  ;;  %v110_v37 = vld [vmem:[%s960_s1 + $0x118] sm:$0xff]  ;;  %v79_v38 = vld [vmem:[%s960_s1 + $0x20] sm:$0xff] }
   0xa   :  { %541 = vmatprep.subr.bf16.mxu0 %v540_v25  ;;  %571 = vmatpush3.bf16.msra.mxu1 %v570_v26  ;;  %v574_v39 = vpack.c.bf16 %v110_v37, %v109_v36  ;;  %v80_v40 = vld [vmem:[%s960_s1 + $0x28] sm:$0xff]  ;;  %v127_v41 = vld [vmem:[%s960_s1 + $0x1a0] sm:$0xff]  ;;  %v97_v44 = vld [vmem:[%s960_s1 + $0xb0] sm:$0xff] }
   0xb   :  { %v128_v42 = vld [vmem:[%s960_s1 + $0x1a8] sm:$0xff]  ;;  %573 = vmatprep.subr.bf16.mxu1 %v572_v34  ;;  %v98_v45 = vld [vmem:[%s960_s1 + $0xb8] sm:$0xff]  ;;  %v111_v46 = vld [vmem:[%s960_s1 + $0x120] sm:$0xff]  ;;  %v546_v47 = vpack.c.bf16 %v80_v40, %v79_v38 }
   0xc   :  { %v576_v43 = vpack.c.bf16 %v128_v42, %v127_v41  ;;  %543 = vmatpush3.bf16.msra.mxu0 %v542_v30  ;;  %v112_v48 = vld [vmem:[%s960_s1 + $0x128] sm:$0xff]  ;;  %v81_v49 = vld [vmem:[%s960_s1 + $0x30] sm:$0xff]  ;;  %v548_v50 = vpack.c.bf16 %v98_v45, %v97_v44  ;;  %v82_v51 = vld [vmem:[%s960_s1 + $0x38] sm:$0xff]  ;;  %v638_v44 = vmov 0.0|0.0  }
   0xd   :  { %545 = vmatprep.subr.bf16.mxu0 %v544_v35  ;;  %v129_v52 = vld [vmem:[%s960_s1 + $0x1b0] sm:$0xff]  ;;  %v130_v53 = vld [vmem:[%s960_s1 + $0x1b8] sm:$0xff]  ;;  %v578_v54 = vpack.c.bf16 %v112_v48, %v111_v46  ;;  %v99_v55 = vld [vmem:[%s960_s1 + $0xc0] sm:$0xff]  ;;  %v550_v60 = vpack.c.bf16 %v82_v51, %v81_v49 }
   0xe   :  { %575 = vmatpush3.bf16.msra.mxu1 %v574_v39  ;;  %v100_v56 = vld [vmem:[%s960_s1 + $0xc8] sm:$0xff]  ;;  %v580_v57 = vpack.c.bf16 %v130_v53, %v129_v52  ;;  %v113_v58 = vld [vmem:[%s960_s1 + $0x130] sm:$0xff]  ;;  %v114_v59 = vld [vmem:[%s960_s1 + $0x138] sm:$0xff] }
   0xf   :  { %577 = vmatprep.subr.bf16.mxu1 %v576_v43  ;;  %v131_v61 = vld [vmem:[%s960_s1 + $0x1c0] sm:$0xff]  ;;  %v132_v62 = vld [vmem:[%s960_s1 + $0x1c8] sm:$0xff]  ;;  %v552_v63 = vpack.c.bf16 %v100_v56, %v99_v55  ;;  %v582_v2 = vpack.c.bf16 %v114_v59, %v113_v58  ;;  %v101_v3 = vld [vmem:[%s960_s1 + $0xd0] sm:$0xff] }
  0x10   :  { %547 = vmatpush3.bf16.msra.mxu0 %v546_v47  ;;  %v83_v0 = vld [vmem:[%s960_s1 + $0x40] sm:$0xff]  ;;  %v84_v1 = vld [vmem:[%s960_s1 + $0x48] sm:$0xff]  ;;  %v102_v4 = vld [vmem:[%s960_s1 + $0xd8] sm:$0xff]  ;;  %v584_v5 = vpack.c.bf16 %v132_v62, %v131_v61 }
  0x11   :  { %549 = vmatprep.subr.bf16.mxu0 %v548_v50  ;;  %v115_v6 = vld [vmem:[%s960_s1 + $0x140] sm:$0xff]  ;;  %v116_v7 = vld [vmem:[%s960_s1 + $0x148] sm:$0xff]  ;;  %v554_v8 = vpack.c.bf16 %v84_v1, %v83_v0  ;;  %v133_v9 = vld [vmem:[%s960_s1 + $0x1d0] sm:$0xff]  ;;  %v556_v11 = vpack.c.bf16 %v102_v4, %v101_v3 }
  0x12   :  { %579 = vmatpush3.bf16.msra.mxu1 %v578_v54  ;;  %v134_v10 = vld [vmem:[%s960_s1 + $0x1d8] sm:$0xff]  ;;  %v85_v12 = vld [vmem:[%s960_s1 + $0x50] sm:$0xff]  ;;  %v586_v14 = vpack.c.bf16 %v116_v7, %v115_v6  ;;  %v103_v15 = vld [vmem:[%s960_s1 + $0xe0] sm:$0xff] }
  0x13   :  { %581 = vmatprep.subr.bf16.mxu1 %v580_v57  ;;  %v86_v13 = vld [vmem:[%s960_s1 + $0x58] sm:$0xff]  ;;  %v104_v16 = vld [vmem:[%s960_s1 + $0xe8] sm:$0xff]  ;;  %v588_v17 = vpack.c.bf16 %v134_v10, %v133_v9  ;;  %v117_v18 = vld [vmem:[%s960_s1 + $0x150] sm:$0xff] }
  0x14   :  { %551 = vmatpush3.bf16.msra.mxu0 %v550_v60  ;;  %v118_v19 = vld [vmem:[%s960_s1 + $0x158] sm:$0xff]  ;;  %v558_v20 = vpack.c.bf16 %v86_v13, %v85_v12  ;;  %v135_v21 = vld [vmem:[%s960_s1 + $0x1e0] sm:$0xff]  ;;  %v136_v22 = vld [vmem:[%s960_s1 + $0x1e8] sm:$0xff]  ;;  %v560_v23 = vpack.c.bf16 %v104_v16, %v103_v15 }
  0x15   :  { %553 = vmatprep.subr.bf16.mxu0 %v552_v63  ;;  %v87_v24 = vld [vmem:[%s960_s1 + $0x60] sm:$0xff]  ;;  %v88_v25 = vld [vmem:[%s960_s1 + $0x68] sm:$0xff]  ;;  %v590_v26 = vpack.c.bf16 %v118_v19, %v117_v18  ;;  %v105_v27 = vld [vmem:[%s960_s1 + $0xf0] sm:$0xff]  ;;  %v592_v29 = vpack.c.bf16 %v136_v22, %v135_v21 }
  0x16   :  { %583 = vmatpush3.bf16.msra.mxu1 %v582_v2  ;;  %v106_v28 = vld [vmem:[%s960_s1 + $0xf8] sm:$0xff]  ;;  %v119_v30 = vld [vmem:[%s960_s1 + $0x160] sm:$0xff]  ;;  %v120_v31 = vld [vmem:[%s960_s1 + $0x168] sm:$0xff]  ;;  %v562_v32 = vpack.c.bf16 %v88_v25, %v87_v24  ;;  %v640_v25 = vmov 0.0  }
  0x17   :  { %585 = vmatprep.subr.bf16.mxu1 %v584_v5  ;;  %v137_v33 = vld [vmem:[%s960_s1 + $0x1f0] sm:$0xff]  ;;  %v138_v34 = vld [vmem:[%s960_s1 + $0x1f8] sm:$0xff]  ;;  %v564_v35 = vpack.c.bf16 %v106_v28, %v105_v27  ;;  %v594_v38 = vpack.c.bf16 %v120_v31, %v119_v30  ;;  %v15_v46 = vld [vmem:[%s959_s0 + $0xc] sm:$0x1] }
  0x18   :  { %555 = vmatpush3.bf16.msra.mxu0 %v554_v8  ;;  %v89_v36 = vld [vmem:[%s960_s1 + $0x70] sm:$0xff]  ;;  %v90_v37 = vld [vmem:[%s960_s1 + $0x78] sm:$0xff]  ;;  %v596_v39 = vpack.c.bf16 %v138_v34, %v137_v33  ;;  %v19_v47 = vld [vmem:[%s959_s0 + $0xe] sm:$0x1] }
  0x19   :  { %557 = vmatprep.subr.bf16.mxu0 %v556_v11  ;;  %v121_v40 = vld [vmem:[%s960_s1 + $0x170] sm:$0xff]  ;;  %v122_v41 = vld [vmem:[%s960_s1 + $0x178] sm:$0xff]  ;;  %v566_v42 = vpack.c.bf16 %v90_v37, %v89_v36  ;;  %v18_v56 = vld [vmem:[%s959_s0 + $0x2] sm:$0x1] }
  0x1a   :  { %587 = vmatpush3.bf16.msra.mxu1 %v586_v14  ;;  %v598_v43 = vpack.c.bf16 %v122_v41, %v121_v40  ;;  %v427_v51 = vld [vmem:[%s959_s0 + $0x11] sm:$0x1]  ;;  %v431_v52 = vld [vmem:[%s959_s0 + $0x14] sm:$0x1]  ;;  %v14_v60 = vld [vmem:[%s959_s0] sm:$0x1] }
  0x1b   :  { %589 = vmatprep.subr.bf16.mxu1 %v588_v17  ;;  %v139_v61 = vld [vmem:[%s960_s1 + $0x200] sm:$0xff]  ;;  %v140_v62 = vld [vmem:[%s960_s1 + $0x208] sm:$0xff]  ;;  %v141_v18 = vld [vmem:[%s960_s1 + $0x210] sm:$0xff] }
  0x1c   :  { %559 = vmatpush3.bf16.msra.mxu0 %v558_v20  ;;  %v430_v3 = vld [vmem:[%s959_s0 + $0x8] sm:$0x1]  ;;  %v426_v5 = vld [vmem:[%s959_s0 + $0x5] sm:$0x1]  ;;  %v601_v13 = vpack.c.bf16 %v140_v62, %v139_v61  ;;  %v142_v19 = vld [vmem:[%s960_s1 + $0x218] sm:$0xff] }
  0x1d   :  { %561 = vmatprep.subr.bf16.mxu0 %v560_v23  ;;  %v604_v22 = vpack.c.bf16 %v142_v19, %v141_v18  ;;  %v143_v23 = vld [vmem:[%s960_s1 + $0x220] sm:$0xff]  ;;  %v144_v24 = vld [vmem:[%s960_s1 + $0x228] sm:$0xff]  ;;  %v145_v27 = vld [vmem:[%s960_s1 + $0x230] sm:$0xff] }
  0x1e   :  { %591 = vmatpush3.bf16.msra.mxu1 %v590_v26  ;;  %v607_v26 = vpack.c.bf16 %v144_v24, %v143_v23  ;;  %v146_v28 = vld [vmem:[%s960_s1 + $0x238] sm:$0xff] }
  0x1f   :  { %593 = vmatprep.subr.bf16.mxu1 %v592_v29  ;;  %v435_v29 = vld [vmem:[%s959_s0 + $0x16] sm:$0x1]  ;;  %v610_v30 = vpack.c.bf16 %v146_v28, %v145_v27 }
  0x20   :  { %563 = vmatpush3.bf16.msra.mxu0 %v562_v32  ;;  %v173_v31 = vrot.slane %v435_v29, 7  ;;  %v434_v32 = vld [vmem:[%s959_s0 + $0xa] sm:$0x1] }
  0x21   :  { %565 = vmatprep.subr.bf16.mxu0 %v564_v35  ;;  %v436_v35 = vld [vmem:[%s961_s2] ss:$0 sm:$0xff] }
  0x22   :  { %595 = vmatpush3.bf16.msra.mxu1 %v594_v38  ;;  %v174_v33 = vsel %vm165_vm1, %v173_v31, %v434_v32 }
  0x23   :  { %597 = vmatprep.subr.bf16.mxu1 %v596_v39 }
  0x24   :  { %567 = vmatpush3.bf16.msra.mxu0 %v566_v42 }
  0x25   :  { %600 = vmatprep.subr.bf16.mxu0 %v638_v44 }
  0x26   :  { %599 = vmatpush3.bf16.msra.mxu1 %v598_v43  ;;  %v641_v43 = vmov 1966171168  }
  0x76   :  { %v619_v45 = vpop.permute.xlu0 %618 }
  0x77   :  { %v621_v48 = vunpack.i.h.bf16 %v619_v45  ;;  %v620_v49 = vunpack.i.l.bf16 %v619_v45  ;;  %v629_v50 = vpop.permute.xlu1 %628  ;;  %v396_v45 = vlaneseq }
  0x78   :  { %v631_v53 = vunpack.i.h.bf16 %v629_v50  ;;  %v630_v54 = vunpack.i.l.bf16 %v629_v50 }
  0x79   :  { %v68_v55 = vsel %vm66_vm0, %v15_v46, %v621_v48  ;;  %v70_v57 = vsel %vm66_vm0, %v19_v47, %v620_v49  ;;  %v397_v47 = vshrl.u32 %v396_v45, 7 }
  0x7a   :  { %v72_v58 = vsel %vm66_vm0, %v427_v51, %v631_v53  ;;  %v624_v59 = vpop.permute.xlu0 %623  ;;  %v74_v63 = vsel %vm66_vm0, %v431_v52, %v630_v54  ;;  %v167_v9 = vrot.slane %v70_v57, 7  ;;  %v164_v10 = vrot.slane %v68_v55, 7 }
  0x7b   :  { %v626_v0 = vunpack.i.h.bf16 %v624_v59  ;;  %v625_v1 = vunpack.i.l.bf16 %v624_v59  ;;  %v634_v2 = vpop.permute.xlu1 %633  ;;  %v171_v4 = vrot.slane %v74_v63, 7  ;;  %v169_v6 = vrot.slane %v72_v58, 7 }
  0x7c   :  { %v636_v7 = vunpack.i.h.bf16 %v634_v2  ;;  %v635_v8 = vunpack.i.l.bf16 %v634_v2 }
  0x7d   :  { %v69_v11 = vsel %vm66_vm0, %v18_v56, %v625_v1  ;;  %v67_v12 = vsel %vm66_vm0, %v14_v60, %v626_v0 }
  0x7e   :  { %v168_v14 = vsel %vm165_vm1, %v167_v9, %v69_v11  ;;  %v166_v15 = vsel %vm165_vm1, %v164_v10, %v67_v12  ;;  %v73_v16 = vsel %vm66_vm0, %v430_v3, %v635_v8  ;;  %v71_v17 = vsel %vm66_vm0, %v426_v5, %v636_v7 }
  0x7f   :  { %245 = vmatprep.mubr.f32.mxu0 %v168_v14  ;;  %v172_v20 = vsel %vm165_vm1, %v171_v4, %v73_v16  ;;  %v170_v21 = vsel %vm165_vm1, %v169_v6, %v71_v17 }
  0x80   :  { %246 = vmatmul.mubr.f32.vlgmr.msra.gmra.mrb[0].mxu0 %v166_v15  ;;  %315 = vmatprep.mubr.f32.mxu1 %v172_v20 }
  0x81   :  { %602 = vmatpush3.bf16.msra.mxu0 %v601_v13  ;;  %316 = vmatmul.mubr.f32.vlgmr.msra.gmra.mrb[0].mxu1 %v170_v21 }
  0x82   :  { %603 = vmatprep.subr.bf16.mxu0 %v638_v44  ;;  %533 = vmatprep.mubr.msk.f32.mxu0 %vm639_vm2, %v640_v25 }
  0x85   :  { %605 = vmatpush3.bf16.msra.mxu0 %v604_v22 }
  0x86   :  { %606 = vmatprep.subr.bf16.mxu0 %v638_v44 }
  0x89   :  { %608 = vmatpush3.bf16.msra.mxu0 %v607_v26 }
  0x8a   :  { %609 = vmatprep.subr.bf16.mxu0 %v638_v44  ;;  %v394_v44 = vunpack.c.l.s4 %v641_v43 }
  0x8c   :  { %v395_v46 = vunpack.c.0.s8 %v394_v44 }
  0x8d   :  { %611 = vmatpush3.bf16.msra.mxu0 %v610_v30 }
  0x8e   :  { %v398_v50 = vsub.s32 %v395_v46, %v397_v47 }
  0x90   :  { %534 = vmatmul.mubr.msk.f32.vlgmr.msra.gmra.mrb[2].mxu0 %vm66_vm0, %v174_v33 }
 0x153   :  { %v470_v34 = vpop.f32.mrb[0].mxu0 }
 0x154   :  { %v471_v36 = vpop.f32.mrb[1].mxu0  ;;  %v505_v37 = vpop.f32.mrb[0].mxu1 }
 0x155   :  { %v472_v38 = vadd.f32 %v471_v36, %v470_v34  ;;  %v506_v39 = vpop.f32.mrb[1].mxu1 }
 0x156   :  { %v507_v40 = vadd.f32 %v506_v39, %v505_v37 }
 0x157   :  { %v248_v41 = vadd.f32 %v472_v38, %v436_v35 }
 0x159   :  { %v318_v42 = vadd.f32 %v507_v40, %v248_v41 }
 0x163   :  { %v387_v48 = vpop.f32.mrb[2].mxu0 }
 0x164   :  { %v388_v49 = vadd.f32 %v387_v48, %v318_v42  ;;  %v535_v51 = vpop.f32.mrb[3].mxu0 }
 0x166   :  { %v391_v52 = vmax.f32 %v388_v49, 0.0 }
 0x168   :  { %v399_v53 = vrot.slane %v391_v52, %v398_v50 }
 0x16a   :  { %v400_v54 = vcombine.high %v399_v53, %v399_v53  ;;  %v407_v55 = vrot.slane %v399_v53, %v398_v50 }
 0x16c   :  { %v414_v56 = vrot.slane %v400_v54, %v398_v50  ;;  %418 = vst.msk [vmem:[%s962_s3] sm:$0x1] %vm417_vm3, %v407_v55 }
 0x16e   :  { %419 = vst.msk [vmem:[%s962_s3 + $0x1] sm:$0x1] %vm417_vm3, %v414_v56 }

// kernel: dqn_forward.7
= control target key start
LH: loop header
LB: loop body
LE: loop exit
PB: predicated region body
PF: predicated region fallthrough
CT: control target
= control target key end

     0   :  { %v647_v7 = vmov 0.0   ;;  %vm76_vm0 = vcmask 523264   ;;  %s990_s0 = inlined_call_operand.vmem [shape: f32[2,64], index: 0, kind: input, shape index: {}]   ;;  %s991_s1 = inlined_call_operand.vmem [shape: f32[64,512], index: 1, kind: input, shape index: {}]   ;;  %s992_s2 = inlined_call_operand.vmem [shape: f32[1,512], index: 2, kind: input, shape index: {}]   ;;  %s993_s3 = inlined_call_operand.vmem [shape: f32[512,128], index: 3, kind: input, shape index: {}]   ;;  %s994_s4 = inlined_call_operand.vmem [shape: f32[1,128], index: 4, kind: input, shape index: {}]   ;;  %s995_s5 = inlined_call_operand.hbm [shape: f32[2,128], index: 5, kind: output, shape index: {}]  }
   0x1   :  { %v23_v0 = vld [vmem:[%s991_s1 + $0x8] sm:$0xff]  ;;  %v25_v2 = vld [vmem:[%s991_s1 + $0x18] sm:$0xff]  ;;  %v22_v5 = vld [vmem:[%s991_s1] sm:$0xff]  ;;  %144 = vmatprep.mubr.f32.mxu0 %v647_v7  ;;  %215 = vmatprep.mubr.f32.mxu1 %v647_v7 }
   0x2   :  { %v27_v1 = vld [vmem:[%s991_s1 + $0x28] sm:$0xff]  ;;  %v29_v4 = vld [vmem:[%s991_s1 + $0x38] sm:$0xff]  ;;  %v26_v6 = vld [vmem:[%s991_s1 + $0x20] sm:$0xff] }
   0x3   :  { %v525_v3 = vpack.c.bf16 %v27_v1, %v23_v0  ;;  %v541_v8 = vpack.c.bf16 %v29_v4, %v25_v2  ;;  %v527_v9 = vpack.c.bf16 %v26_v6, %v22_v5  ;;  %v24_v10 = vld [vmem:[%s991_s1 + $0x10] sm:$0xff]  ;;  %v31_v12 = vld [vmem:[%s991_s1 + $0x48] sm:$0xff]  ;;  %v33_v15 = vld [vmem:[%s991_s1 + $0x58] sm:$0xff] }
   0x4   :  { %v28_v11 = vld [vmem:[%s991_s1 + $0x30] sm:$0xff]  ;;  %v35_v14 = vld [vmem:[%s991_s1 + $0x68] sm:$0xff]  ;;  %v37_v16 = vld [vmem:[%s991_s1 + $0x78] sm:$0xff] }
   0x5   :  { %526 = vmatprep.subr.bf16.mxu0 %v525_v3  ;;  %v543_v13 = vpack.c.bf16 %v28_v11, %v24_v10  ;;  %542 = vmatprep.subr.bf16.mxu1 %v541_v8  ;;  %v529_v17 = vpack.c.bf16 %v35_v14, %v31_v12  ;;  %v545_v18 = vpack.c.bf16 %v37_v16, %v33_v15  ;;  %v30_v19 = vld [vmem:[%s991_s1 + $0x40] sm:$0xff]  ;;  %v32_v21 = vld [vmem:[%s991_s1 + $0x50] sm:$0xff]  ;;  %v39_v24 = vld [vmem:[%s991_s1 + $0x88] sm:$0xff] }
   0x6   :  { %528 = vmatpush1.bf16.msra.mxu0 %v527_v9  ;;  %v34_v20 = vld [vmem:[%s991_s1 + $0x60] sm:$0xff]  ;;  %v36_v23 = vld [vmem:[%s991_s1 + $0x70] sm:$0xff]  ;;  %v43_v25 = vld [vmem:[%s991_s1 + $0xa8] sm:$0xff] }
   0x7   :  { %544 = vmatpush1.bf16.msra.mxu1 %v543_v13  ;;  %v531_v22 = vpack.c.bf16 %v34_v20, %v30_v19  ;;  %530 = vmatprep.subr.bf16.mxu0 %v529_v17  ;;  %v547_v26 = vpack.c.bf16 %v36_v23, %v32_v21  ;;  %v533_v27 = vpack.c.bf16 %v43_v25, %v39_v24  ;;  %v41_v28 = vld [vmem:[%s991_s1 + $0x98] sm:$0xff]  ;;  %v38_v30 = vld [vmem:[%s991_s1 + $0x80] sm:$0xff]  ;;  %v40_v33 = vld [vmem:[%s991_s1 + $0x90] sm:$0xff] }
   0x8   :  { %546 = vmatprep.subr.bf16.mxu1 %v545_v18  ;;  %v45_v29 = vld [vmem:[%s991_s1 + $0xb8] sm:$0xff]  ;;  %v42_v32 = vld [vmem:[%s991_s1 + $0xa0] sm:$0xff]  ;;  %v44_v34 = vld [vmem:[%s991_s1 + $0xb0] sm:$0xff] }
   0x9   :  { %v549_v31 = vpack.c.bf16 %v45_v29, %v41_v28  ;;  %v535_v35 = vpack.c.bf16 %v42_v32, %v38_v30  ;;  %v47_v36 = vld [vmem:[%s991_s1 + $0xc8] sm:$0xff]  ;;  %v49_v38 = vld [vmem:[%s991_s1 + $0xd8] sm:$0xff]  ;;  %v551_v39 = vpack.c.bf16 %v44_v34, %v40_v33  ;;  %v46_v42 = vld [vmem:[%s991_s1 + $0xc0] sm:$0xff] }
   0xa   :  { %532 = vmatpush1.bf16.msra.mxu0 %v531_v22  ;;  %v51_v37 = vld [vmem:[%s991_s1 + $0xe8] sm:$0xff]  ;;  %v53_v41 = vld [vmem:[%s991_s1 + $0xf8] sm:$0xff]  ;;  %v50_v43 = vld [vmem:[%s991_s1 + $0xe0] sm:$0xff] }
   0xb   :  { %548 = vmatpush1.bf16.msra.mxu1 %v547_v26  ;;  %534 = vmatprep.subr.bf16.mxu0 %v533_v27  ;;  %v537_v40 = vpack.c.bf16 %v51_v37, %v47_v36  ;;  %v553_v44 = vpack.c.bf16 %v53_v41, %v49_v38  ;;  %v48_v45 = vld [vmem:[%s991_s1 + $0xd0] sm:$0xff]  ;;  %v242_v47 = vld [vmem:[%s993_s3 + $0x80] sm:$0xff]  ;;  %v243_v48 = vld [vmem:[%s993_s3 + $0x88] sm:$0xff]  ;;  %v539_v50 = vpack.c.bf16 %v50_v43, %v46_v42 }
   0xc   :  { %550 = vmatprep.subr.bf16.mxu1 %v549_v31  ;;  %v52_v46 = vld [vmem:[%s991_s1 + $0xf0] sm:$0xff]  ;;  %v274_v49 = vld [vmem:[%s993_s3 + $0x180] sm:$0xff]  ;;  %v275_v51 = vld [vmem:[%s993_s3 + $0x188] sm:$0xff]  ;;  %v557_v53 = vpack.c.bf16 %v243_v48, %v242_v47 }
   0xd   :  { %v555_v52 = vpack.c.bf16 %v52_v46, %v48_v45  ;;  %v226_v54 = vld [vmem:[%s993_s3] sm:$0xff]  ;;  %v227_v55 = vld [vmem:[%s993_s3 + $0x8] sm:$0xff]  ;;  %v589_v57 = vpack.c.bf16 %v275_v51, %v274_v49  ;;  %v244_v59 = vld [vmem:[%s993_s3 + $0x90] sm:$0xff] }
   0xe   :  { %536 = vmatpush1.bf16.msra.mxu0 %v535_v35  ;;  %v258_v56 = vld [vmem:[%s993_s3 + $0x100] sm:$0xff]  ;;  %v259_v58 = vld [vmem:[%s993_s3 + $0x108] sm:$0xff]  ;;  %v245_v60 = vld [vmem:[%s993_s3 + $0x98] sm:$0xff]  ;;  %v559_v0 = vpack.c.bf16 %v227_v55, %v226_v54 }
   0xf   :  { %552 = vmatpush1.bf16.msra.mxu1 %v551_v39  ;;  %538 = vmatprep.subr.bf16.mxu0 %v537_v40  ;;  %v276_v61 = vld [vmem:[%s993_s3 + $0x190] sm:$0xff]  ;;  %v277_v62 = vld [vmem:[%s993_s3 + $0x198] sm:$0xff]  ;;  %v21_v63 = vld [vmem:[%s990_s0] sm:$0x3]  ;;  %v591_v1 = vpack.c.bf16 %v259_v58, %v258_v56  ;;  %v561_v2 = vpack.c.bf16 %v245_v60, %v244_v59 }
  0x10   :  { %554 = vmatprep.subr.bf16.mxu1 %v553_v44  ;;  %v228_v3 = vld [vmem:[%s993_s3 + $0x10] sm:$0xff]  ;;  %v229_v4 = vld [vmem:[%s993_s3 + $0x18] sm:$0xff]  ;;  %v593_v6 = vpack.c.bf16 %v277_v62, %v276_v61  ;;  %v246_v8 = vld [vmem:[%s993_s3 + $0xa0] sm:$0xff] }
  0x11   :  { %v260_v5 = vld [vmem:[%s993_s3 + $0x110] sm:$0xff]  ;;  %v261_v7 = vld [vmem:[%s993_s3 + $0x118] sm:$0xff]  ;;  %v247_v9 = vld [vmem:[%s993_s3 + $0xa8] sm:$0xff]  ;;  %v563_v12 = vpack.c.bf16 %v229_v4, %v228_v3 }
  0x12   :  { %540 = vmatpush1.bf16.msra.mxu0 %v539_v50  ;;  %v278_v10 = vld [vmem:[%s993_s3 + $0x1a0] sm:$0xff]  ;;  %v279_v11 = vld [vmem:[%s993_s3 + $0x1a8] sm:$0xff]  ;;  %v595_v13 = vpack.c.bf16 %v261_v7, %v260_v5  ;;  %v565_v14 = vpack.c.bf16 %v247_v9, %v246_v8  ;;  %v248_v20 = vld [vmem:[%s993_s3 + $0xb0] sm:$0xff] }
  0x13   :  { %556 = vmatpush1.bf16.msra.mxu1 %v555_v52  ;;  %558 = vmatprep.subr.bf16.mxu0 %v557_v53  ;;  %v230_v15 = vld [vmem:[%s993_s3 + $0x20] sm:$0xff]  ;;  %v231_v16 = vld [vmem:[%s993_s3 + $0x28] sm:$0xff]  ;;  %v597_v18 = vpack.c.bf16 %v279_v11, %v278_v10  ;;  %v249_v21 = vld [vmem:[%s993_s3 + $0xb8] sm:$0xff] }
  0x14   :  { %590 = vmatprep.subr.bf16.mxu1 %v589_v57  ;;  %v262_v17 = vld [vmem:[%s993_s3 + $0x120] sm:$0xff]  ;;  %v263_v19 = vld [vmem:[%s993_s3 + $0x128] sm:$0xff]  ;;  %v280_v22 = vld [vmem:[%s993_s3 + $0x1b0] sm:$0xff]  ;;  %v567_v24 = vpack.c.bf16 %v231_v16, %v230_v15  ;;  %v569_v26 = vpack.c.bf16 %v249_v21, %v248_v20 }
  0x15   :  { %452 = vmatmul.mubr.msk.f32.vlgmr.msra.gmra.mrb[0].mxu0 %vm76_vm0, %v21_v63  ;;  %v281_v23 = vld [vmem:[%s993_s3 + $0x1b8] sm:$0xff]  ;;  %v599_v25 = vpack.c.bf16 %v263_v19, %v262_v17  ;;  %v232_v27 = vld [vmem:[%s993_s3 + $0x30] sm:$0xff]  ;;  %v250_v32 = vld [vmem:[%s993_s3 + $0xc0] sm:$0xff] }
  0x16   :  { %453 = vmatmul.mubr.msk.f32.vlgmr.msra.gmra.mrb[0].mxu1 %vm76_vm0, %v21_v63  ;;  %560 = vmatpush3.bf16.msra.mxu0 %v559_v0  ;;  %v233_v28 = vld [vmem:[%s993_s3 + $0x38] sm:$0xff]  ;;  %v264_v29 = vld [vmem:[%s993_s3 + $0x130] sm:$0xff]  ;;  %v601_v30 = vpack.c.bf16 %v281_v23, %v280_v22  ;;  %v251_v33 = vld [vmem:[%s993_s3 + $0xc8] sm:$0xff] }
  0x17   :  { %592 = vmatpush3.bf16.msra.mxu1 %v591_v1  ;;  %562 = vmatprep.subr.bf16.mxu0 %v561_v2  ;;  %v265_v31 = vld [vmem:[%s993_s3 + $0x138] sm:$0xff]  ;;  %v282_v34 = vld [vmem:[%s993_s3 + $0x1c0] sm:$0xff]  ;;  %v283_v35 = vld [vmem:[%s993_s3 + $0x1c8] sm:$0xff]  ;;  %v571_v36 = vpack.c.bf16 %v233_v28, %v232_v27 }
  0x18   :  { %594 = vmatprep.subr.bf16.mxu1 %v593_v6 }
  0x1a   :  { %564 = vmatpush3.bf16.msra.mxu0 %v563_v12 }
  0x1b   :  { %596 = vmatpush3.bf16.msra.mxu1 %v595_v13  ;;  %566 = vmatprep.subr.bf16.mxu0 %v565_v14 }
  0x1c   :  { %598 = vmatprep.subr.bf16.mxu1 %v597_v18 }
  0x1e   :  { %568 = vmatpush3.bf16.msra.mxu0 %v567_v24 }
  0x1f   :  { %10 = vsyncpa [#allocation3], 0  ;;  %600 = vmatpush3.bf16.msra.mxu1 %v599_v25  ;;  %570 = vmatprep.subr.bf16.mxu0 %v569_v26  ;;  %v603_v37 = vpack.c.bf16 %v265_v31, %v264_v29  ;;  %v573_v38 = vpack.c.bf16 %v251_v33, %v250_v32  ;;  %v234_v39 = vld [vmem:[%s993_s3 + $0x40] sm:$0xff]  ;;  %v235_v40 = vld [vmem:[%s993_s3 + $0x48] sm:$0xff]  ;;  %v605_v42 = vpack.c.bf16 %v283_v35, %v282_v34  ;;  %v56_v18 = vlaneseq  ;;  %s648_s30 = smov [#allocation2]  }
  0x20   :  { %v266_v41 = vld [vmem:[%s993_s3 + $0x140] sm:$0xff]  ;;  %602 = vmatprep.subr.bf16.mxu1 %v601_v30  ;;  %v267_v43 = vld [vmem:[%s993_s3 + $0x148] sm:$0xff]  ;;  %v252_v44 = vld [vmem:[%s993_s3 + $0xd0] sm:$0xff]  ;;  %v575_v48 = vpack.c.bf16 %v235_v40, %v234_v39  ;;  %s444_s6 = sshll.u32 %s648_s30, 4  ;;  %s445_s6 = int_to_ptr.vmem [resolvable:$true] %s444_s6 }
  0x21   :  { %v253_v45 = vld [vmem:[%s993_s3 + $0xd8] sm:$0xff]  ;;  %v284_v46 = vld [vmem:[%s993_s3 + $0x1d0] sm:$0xff]  ;;  %v607_v49 = vpack.c.bf16 %v267_v43, %v266_v41  ;;  %v254_v56 = vld [vmem:[%s993_s3 + $0xe0] sm:$0xff]  ;;  %v57_v19 = vshrl.u32 %v56_v18, 7  ;;  %s623_s7 = scalar_lea.vmem %s445_s6, 32  ;;  %p628_p1 = scmp.lt.s32.totalorder %s445_s6, %s445_s6 }
  0x22   :  { %v285_v47 = vld [vmem:[%s993_s3 + $0x1d8] sm:$0xff]  ;;  %572 = vmatpush3.bf16.msra.mxu0 %v571_v36  ;;  %v577_v50 = vpack.c.bf16 %v253_v45, %v252_v44  ;;  %v236_v51 = vld [vmem:[%s993_s3 + $0x50] sm:$0xff]  ;;  %v255_v57 = vld [vmem:[%s993_s3 + $0xe8] sm:$0xff]  ;;  %p624_p0 = scmp.ne.s32.totalorder %s445_s6, %s623_s7  ;;  %p629_p2 = scmp.lt.s32.totalorder %s623_s7, %s623_s7 }
  0x23   :  { %604 = vmatpush3.bf16.msra.mxu1 %v603_v37  ;;  %574 = vmatprep.subr.bf16.mxu0 %v573_v38  ;;  %v237_v52 = vld [vmem:[%s993_s3 + $0x58] sm:$0xff]  ;;  %v268_v53 = vld [vmem:[%s993_s3 + $0x150] sm:$0xff]  ;;  %v609_v54 = vpack.c.bf16 %v285_v47, %v284_v46  ;;  %v286_v58 = vld [vmem:[%s993_s3 + $0x1e0] sm:$0xff]  ;;  %v581_v62 = vpack.c.bf16 %v255_v57, %v254_v56  ;;  %v58_v20 = vsub.s32 0, %v57_v19  ;;  %v66_v22 = vsub.s32 2, %v57_v19 }
  0x24   :  { %606 = vmatprep.subr.bf16.mxu1 %v605_v42  ;;  %v269_v55 = vld [vmem:[%s993_s3 + $0x158] sm:$0xff]  ;;  %v287_v59 = vld [vmem:[%s993_s3 + $0x1e8] sm:$0xff]  ;;  %v579_v60 = vpack.c.bf16 %v237_v52, %v236_v51  ;;  %v238_v0 = vld [vmem:[%s993_s3 + $0x60] sm:$0xff]  ;;  %v62_v23 = vsub.s32 1, %v57_v19  ;;  %v70_v24 = vsub.s32 3, %v57_v19  ;;  %p630_p3 = por %p629_p2, %p628_p1 }
  0x25   :  { %v611_v61 = vpack.c.bf16 %v269_v55, %v268_v53  ;;  %v613_v63 = vpack.c.bf16 %v287_v59, %v286_v58  ;;  %v239_v1 = vld [vmem:[%s993_s3 + $0x68] sm:$0xff]  ;;  %v270_v2 = vld [vmem:[%s993_s3 + $0x160] sm:$0xff]  ;;  %v256_v6 = vld [vmem:[%s993_s3 + $0xf0] sm:$0xff] }
  0x26   :  { %576 = vmatpush3.bf16.msra.mxu0 %v575_v48  ;;  %v583_v3 = vpack.c.bf16 %v239_v1, %v238_v0  ;;  %v271_v4 = vld [vmem:[%s993_s3 + $0x168] sm:$0xff]  ;;  %v257_v7 = vld [vmem:[%s993_s3 + $0xf8] sm:$0xff]  ;;  %v288_v8 = vld [vmem:[%s993_s3 + $0x1f0] sm:$0xff]  ;;  %p631_p4 = pnand %p630_p3, %p624_p0 }
  0x27   :  { %608 = vmatpush3.bf16.msra.mxu1 %v607_v49  ;;  %578 = vmatprep.subr.bf16.mxu0 %v577_v50  ;;  %v615_v5 = vpack.c.bf16 %v271_v4, %v270_v2  ;;  %v585_v9 = vpack.c.bf16 %v257_v7, %v256_v6  ;;  %v289_v10 = vld [vmem:[%s993_s3 + $0x1f8] sm:$0xff]  ;;  %v240_v11 = vld [vmem:[%s993_s3 + $0x70] sm:$0xff]  ;;  %v54_v21 = vld [vmem:[%s992_s2] sm:$0xf] }
  0x28   :  { %610 = vmatprep.subr.bf16.mxu1 %v609_v54  ;;  %v241_v12 = vld [vmem:[%s993_s3 + $0x78] sm:$0xff]  ;;  %v617_v13 = vpack.c.bf16 %v289_v10, %v288_v8  ;;  %v272_v15 = vld [vmem:[%s993_s3 + $0x170] sm:$0xff]  ;;  %v59_v25 = vrot.slane %v54_v21, %v58_v20  ;;  %v67_v26 = vrot.slane %v54_v21, %v66_v22  ;;  %v63_v27 = vrot.slane %v54_v21, %v62_v23  ;;  %v454_v43 = vld [vmem:[%s994_s4] ss:$0 sm:$0xff] }
  0x29   :  { %v587_v14 = vpack.c.bf16 %v241_v12, %v240_v11  ;;  %v273_v16 = vld [vmem:[%s993_s3 + $0x178] sm:$0xff]  ;;  %v71_v28 = vrot.slane %v54_v21, %v70_v24 }
  0x2a   :  { %580 = vmatpush3.bf16.msra.mxu0 %v579_v60  ;;  %v619_v17 = vpack.c.bf16 %v273_v16, %v272_v15 }
  0x2b   :  { %612 = vmatpush3.bf16.msra.mxu1 %v611_v61  ;;  %582 = vmatprep.subr.bf16.mxu0 %v581_v62 }
  0x2c   :  { %614 = vmatprep.subr.bf16.mxu1 %v613_v63 }
  0x2e   :  { %584 = vmatpush3.bf16.msra.mxu0 %v583_v3 }
  0x2f   :  { %616 = vmatpush3.bf16.msra.mxu1 %v615_v5  ;;  %586 = vmatprep.subr.bf16.mxu0 %v585_v9 }
  0x30   :  { %618 = vmatprep.subr.bf16.mxu1 %v617_v13 }
  0x32   :  { %588 = vmatpush3.bf16.msra.mxu0 %v587_v14 }
  0x33   :  { %620 = vmatpush3.bf16.msra.mxu1 %v619_v17 }
  0xe8   :  { %v146_v29 = vpop.f32.mrb[0].mxu0 }
  0xe9   :  { %v147_v30 = vadd.f32 %v146_v29, %v59_v25  ;;  %v217_v31 = vpop.f32.mrb[0].mxu1  ;;  %v148_v32 = vpop.f32.mrb[1].mxu0 }
  0xea   :  { %v218_v33 = vadd.f32 %v217_v31, %v67_v26  ;;  %v149_v34 = vadd.f32 %v148_v32, %v63_v27  ;;  %v219_v35 = vpop.f32.mrb[1].mxu1 }
  0xeb   :  { %v220_v36 = vadd.f32 %v219_v35, %v71_v28  ;;  %v222_v39 = vmax.f32 %v147_v30, 0.0 }
  0xec   :  { %v224_v37 = vmax.f32 %v218_v33, 0.0  ;;  %v223_v38 = vmax.f32 %v149_v34, 0.0 }
  0xed   :  { %v225_v40 = vmax.f32 %v220_v36, 0.0 }
  0xee   :  { %361 = vmatprep.mubr.f32.mxu0 %v223_v38 }
  0xef   :  { %431 = vmatprep.mubr.f32.mxu1 %v225_v40  ;;  %362 = vmatmul.mubr.f32.vlgmr.msra.gmra.mrb[2].mxu0 %v222_v39 }
  0xf0   :  { %432 = vmatmul.mubr.f32.vlgmr.msra.gmra.mrb[2].mxu1 %v224_v37 }
 0x1c2   :  { %v487_v41 = vpop.f32.mrb[2].mxu0 }
 0x1c3   :  { %v522_v42 = vpop.f32.mrb[2].mxu1  ;;  %v488_v44 = vpop.f32.mrb[3].mxu0 }
 0x1c4   :  { %v489_v45 = vadd.f32 %v488_v44, %v487_v41  ;;  %v523_v46 = vpop.f32.mrb[3].mxu1 }
 0x1c5   :  { %v524_v47 = vadd.f32 %v523_v46, %v522_v42 }
 0x1c6   :  { %v364_v48 = vadd.f32 %v489_v45, %v454_v43 }
 0x1c8   :  { %v434_v49 = vadd.f32 %v524_v47, %v364_v48 }
 0x1ca   :  { %437 = vst [vmem:[#allocation2] sm:$0x3] %v434_v49 }
 0x1cb   :  { %634 = shalt.err (!%p631_p4)
}
 0x1cc   :  { %s635_s4 = scalar_lea.hbm %s995_s5, 32 }
 0x1cd   :  { %p636_p5 = scmp.ne.s32.totalorder %s995_s5, %s635_s4  ;;  %p639_p6 = scmp.lt.u32.totalorder %s635_s4, %s995_s5 }
 0x1cf   :  { %p641_p7 = pnand %p639_p6, %p636_p5 }
 0x1d1   :  { %644 = shalt.err (!%p641_p7)
}
 0x1d2   :  { %447 = dma.vmem_to_hbm [thread:$0]  %s445_s6, 32, %s995_s5, [#allocation3]  }
 0x1d3   :  { %645 = dma.done.wait [#allocation3], 32  }
 0x1d4   :  { %646 = vsyncadd [#allocation3], 4294967264 }
 0x1d5   :  { %451 = vsyncpa [#allocation3], 1 }

</bundles_post_ra>
